<compile_context>
chip_gen: v7x
topology: tpu7x:2x2x1
jax: 0.10.0
libtpu: 0.0.40
codegen_flags: <defaults>
</compile_context>

<pallas_src>
import functools

import numpy as np

import jax
import jax.numpy as jnp
from jax.experimental import pallas as pl
from jax.experimental.pallas import tpu as pltpu


# ----------------------------- Pallas kernel ------------------------------- #

def _d_get_logits_kernel(x_ref, s_ref, w1_ref, gamma_ref, beta_ref, w2_ref,
                         sel_ref, b2_ref, out_ref, *, n_taps, batch, eps,
                         compute_dtype):
    # x_ref     : (R, Cp)      R = B*H*W rows, Cp = 128-padded input channels
    # s_ref     : (9*R, R)     constant 0/1 shift + border-mask gather matrices
    # w1_ref    : (9*Cp, Fp)   conv3x3 weights per tap, Fp = 128-padded out ch.
    # gamma/beta: (1, Fp)      BatchNorm affine (padded channels are zero)
    # w2_ref    : (HW, Fp)     final 4x4 conv weight per (spatial pos, channel)
    # sel_ref   : (B, R)       constant 0/1 per-batch row selector
    # b2_ref    : (1, 1)       final conv bias
    # out_ref   : (B, 1)       sigmoid(logit) per batch element
    rows, cin_p = x_ref.shape
    cout_p = w1_ref.shape[1]
    use_lowp = compute_dtype != jnp.float32

    x = x_ref[...]
    if use_lowp:
        x = x.astype(compute_dtype)

    # conv3x3 == sum over the 9 taps of (gathered/masked rows) @ (tap weights).
    # The gather matrices are exact 0/1 selectors, so doing the shift on the
    # MXU costs no precision and avoids any im2col buffer.
    y = jnp.zeros((rows, cout_p), dtype=jnp.float32)
    for t in range(n_taps):
        s_t = s_ref[pl.ds(t * rows, rows), :]          # aligned static slice
        w_t = w1_ref[pl.ds(t * cin_p, cin_p), :]       # aligned static slice
        if use_lowp:
            s_t = s_t.astype(compute_dtype)
            w_t = w_t.astype(compute_dtype)
        g_t = jnp.dot(s_t, x, preferred_element_type=jnp.float32)
        if use_lowp:
            g_t = g_t.astype(compute_dtype)
        y = y + jnp.dot(g_t, w_t, preferred_element_type=jnp.float32)

    # BatchNorm2d (training mode): biased batch statistics over B*H*W rows.
    # Kept in f32 on all generations (v5e has no bf16 VPU/EUP path).
    mean = jnp.mean(y, axis=0, keepdims=True)
    var = jnp.mean(jnp.square(y - mean), axis=0, keepdims=True)
    y = (y - mean) * jax.lax.rsqrt(var + eps)
    y = y * gamma_ref[...] + beta_ref[...]

    # LeakyReLU(0.2)
    y = jnp.where(y >= 0, y, 0.2 * y)

    # Final Conv2d(F -> 1, k=4, s=4) on the 4x4 map: weight every
    # (row, channel) element, sum rows per batch element on the MXU via the
    # precomputed selector, then one small lane reduction.
    w2t = jnp.concatenate([w2_ref[...]] * batch, axis=0)                 # (R, Fp)
    m = jnp.dot(sel_ref[...], y * w2t, preferred_element_type=jnp.float32)
    logit = jnp.sum(m, axis=1, keepdims=True) + b2_ref[0, 0]             # (B, 1)
    # TODO(synk): for large B emit a lane-dense (1, round_up(B, 128)) slab
    # instead of this tiny masked (B, 1) store.
    out_ref[...] = jax.nn.sigmoid(logit)


# ------------------------------- Wrapper ------------------------------------ #

def _round_up(x, m):
    return (x + m - 1) // m * m


@functools.partial(jax.jit, static_argnames=("eps", "use_bf16"))
def d_get_logits(h_code_nchw, c_code, params, *, eps=1e-5, use_bf16=False):
    """Pallas implementation of D_GET_LOGITS.forward (bcondition=True).

    h_code_nchw : (B, ndf*8, 4, 4) float32 (PyTorch NCHW convention)
    c_code      : (B, nef)         float32
    params      : dict with w1 (F, Cin, 3, 3), gamma (F,), beta (F,),
                  w2 (1, F, 4, 4), b2 (1,)
    returns     : (B,) float32
    """
    B, cd, H, W = h_code_nchw.shape
    nef = c_code.shape[1]
    cin = cd + nef
    cout = params["w1"].shape[0]
    hw = H * W
    rows = B * hw
    cin_p = _round_up(cin, 128)
    cout_p = _round_up(cout, 128)

    # --- activations: NCHW -> NHWC, broadcast condition, concat, flatten rows,
    #     zero-pad channels to a lane-dense multiple of 128.  Under jit this
    #     fuses into one small XLA op producing a single ~32 KB HBM slab (the
    #     old 9x im2col expansion is gone).
    h_nhwc = jnp.transpose(h_code_nchw, (0, 2, 3, 1))                    # (B,H,W,cd)
    c_bcast = jnp.broadcast_to(c_code[:, None, None, :], (B, H, W, nef))
    x2d = jnp.concatenate([h_nhwc, c_bcast], axis=-1).reshape(rows, cin)
    x2d = jnp.pad(x2d, ((0, 0), (0, cin_p - cin))).astype(jnp.float32)   # (R, Cp)

    # --- conv3x3 weights per tap: (F, Cin, 3, 3) -> (9, Cp, Fp) -> (9*Cp, Fp)
    w1 = jnp.transpose(params["w1"], (2, 3, 1, 0)).reshape(9, cin, cout)
    w1 = jnp.pad(w1, ((0, 0), (0, cin_p - cin), (0, cout_p - cout)))
    w1_2d = w1.reshape(9 * cin_p, cout_p).astype(jnp.float32)

    # --- compile-time constant shift/mask gather matrices: for tap (di, dj),
    #     row (b, h, w) of S_t selects input row (b, h+di-1, w+dj-1), or is all
    #     zero when that position falls into the conv's zero padding.
    s_np = np.zeros((9 * rows, rows), dtype=np.float32)
    for di in range(3):
        for dj in range(3):
            t = di * 3 + dj
            for b in range(B):
                for h in range(H):
                    for w in range(W):
                        hh, ww = h + di - 1, w + dj - 1
                        if 0 <= hh < H and 0 <= ww < W:
                            r_out = b * hw + h * W + w
                            r_in = b * hw + hh * W + ww
                            s_np[t * rows + r_out, r_in] = 1.0
    shift_mat = jnp.asarray(s_np)

    # --- BatchNorm affine params; padded channels get gamma = beta = 0 so they
    #     cannot leak into the logit.
    gamma = jnp.pad(params["gamma"].reshape(1, cout),
                    ((0, 0), (0, cout_p - cout))).astype(jnp.float32)
    beta = jnp.pad(params["beta"].reshape(1, cout),
                   ((0, 0), (0, cout_p - cout))).astype(jnp.float32)

    # --- final 4x4/stride-4 conv weights: (1, F, 4, 4) -> (HW, Fp), untiled
    #     (per-batch tiling happens inside the kernel in VMEM).
    w2m = jnp.transpose(params["w2"][0], (1, 2, 0)).reshape(hw, cout)
    w2m = jnp.pad(w2m, ((0, 0), (0, cout_p - cout))).astype(jnp.float32)

    # --- constant per-batch row selector, fused in-kernel with the w2 weighting
    sel = jnp.asarray(np.repeat(np.eye(B, dtype=np.float32), hw, axis=1))  # (B, R)

    b2 = params["b2"].reshape(1, 1).astype(jnp.float32)

    vmem = pltpu.MemorySpace.VMEM
    kernel = functools.partial(
        _d_get_logits_kernel, n_taps=9, batch=B, eps=eps,
        compute_dtype=jnp.bfloat16 if use_bf16 else jnp.float32)

    out = pl.pallas_call(
        kernel,
        out_shape=jax.ShapeDtypeStruct((B, 1), jnp.float32),
        in_specs=[pl.BlockSpec(memory_space=vmem)] * 8,
        out_specs=pl.BlockSpec(memory_space=vmem),
        # Working set is < 1 MiB here, so no grid / compiler_params are needed
        # on v5e/v6e/v7x.  See TODO(synk) at the top for production widths.
    )(x2d, shift_mat, w1_2d, gamma, beta, w2m, sel, b2)

    return out.reshape(-1)


# ------------------------------ Reference ----------------------------------- #

def d_get_logits_reference(h_code_nchw, c_code, params, *, eps=1e-5):
    """Pure-JAX reference mirroring the PyTorch forward (NCHW)."""
    B, _, H, W = h_code_nchw.shape
    nef = c_code.shape[1]
    c = jnp.broadcast_to(c_code[:, :, None, None], (B, nef, H, W))
    x = jnp.concatenate([h_code_nchw, c], axis=1)
    y = jax.lax.conv_general_dilated(
        x, params["w1"], window_strides=(1, 1), padding=((1, 1), (1, 1)),
        dimension_numbers=("NCHW", "OIHW", "NCHW"))
    mean = jnp.mean(y, axis=(0, 2, 3), keepdims=True)
    var = jnp.mean(jnp.square(y - mean), axis=(0, 2, 3), keepdims=True)
    y = (y - mean) * jax.lax.rsqrt(var + eps)
    y = y * params["gamma"][None, :, None, None] + params["beta"][None, :, None, None]
    y = jnp.where(y >= 0, y, 0.2 * y)
    z = jax.lax.conv_general_dilated(
        y, params["w2"], window_strides=(4, 4), padding="VALID",
        dimension_numbers=("NCHW", "OIHW", "NCHW"))
    z = z + params["b2"][None, :, None, None]
    return jax.nn.sigmoid(z).reshape(-1)


# --------------------------------- Main ------------------------------------- #

if __name__ == "__main__":
    ndf, nef = 8, 16          # ndf*8 = 64 channels, nef = 16 condition dims
    B, H, W = 4, 4, 4         # spatial must be 4x4 (final conv is k=4, s=4)
    cd = ndf * 8
    cin = cd + nef

    key = jax.random.PRNGKey(0)
    k_h, k_c, k_w1, k_w2, k_b2 = jax.random.split(key, 5)

    h_code = jax.random.normal(k_h, (B, cd, H, W), dtype=jnp.float32)
    c_code = jax.random.normal(k_c, (B, nef), dtype=jnp.float32)

    params = {
        "w1": 0.05 * jax.random.normal(k_w1, (cd, cin, 3, 3), dtype=jnp.float32),
        "gamma": jnp.ones((cd,), dtype=jnp.float32),    # BatchNorm2d init
        "beta": jnp.zeros((cd,), dtype=jnp.float32),
        "w2": 0.05 * jax.random.normal(k_w2, (1, cd, 4, 4), dtype=jnp.float32),
        "b2": 0.05 * jax.random.normal(k_b2, (1,), dtype=jnp.float32),
    }

    ref = jax.block_until_ready(d_get_logits_reference(h_code, c_code, params))

    # Default (exact f32 MXU) path.
    out = jax.block_until_ready(d_get_logits(h_code, c_code, params))
    assert out.shape == (B,), f"bad output shape {out.shape}"
    assert jnp.allclose(out, ref, atol=2e-4, rtol=2e-4), (out, ref)

    # bf16-operand / f32-accumulation MXU path (throughput option for
    # production widths); checked at bf16-appropriate tolerance.
    out_bf16 = jax.block_until_ready(
        d_get_logits(h_code, c_code, params, use_bf16=True))
    assert out_bf16.shape == (B,), f"bad output shape {out_bf16.shape}"
    assert jnp.allclose(out_bf16, ref, atol=3e-2, rtol=3e-2), (out_bf16, ref)

    print("KERNEL_OK")
</pallas_src>

<mosaic_0001>
module attributes {stable_mosaic.version = 11 : i64} {
  func.func @_d_get_logits_kernel(%arg0: memref<64x128xf32, #tpu.memory_space<vmem>>, %arg1: memref<576x64xf32, #tpu.memory_space<vmem>>, %arg2: memref<1152x128xf32, #tpu.memory_space<vmem>>, %arg3: memref<1x128xf32, #tpu.memory_space<vmem>>, %arg4: memref<1x128xf32, #tpu.memory_space<vmem>>, %arg5: memref<16x128xf32, #tpu.memory_space<vmem>>, %arg6: memref<4x64xf32, #tpu.memory_space<vmem>>, %arg7: memref<1x1xf32, #tpu.memory_space<vmem>>, %arg8: memref<4x1xf32, #tpu.memory_space<vmem>>) attributes {dimension_semantics = [], scalar_prefetch = 0 : i64, scratch_operands = 0 : i64, tpu.core_type = #tpu.core_type<tc>} {
    %c0 = arith.constant 0 : index
    %c0_0 = arith.constant 0 : index
    %0 = vector.load %arg0[%c0, %c0_0] : memref<64x128xf32, #tpu.memory_space<vmem>>, vector<64x128xf32>
    %cst = arith.constant 0.000000e+00 : f32
    %1 = vector.broadcast %cst : f32 to vector<64x128xf32>
    %c0_1 = arith.constant 0 : index
    %c0_2 = arith.constant 0 : index
    %2 = vector.load %arg1[%c0_1, %c0_2] : memref<576x64xf32, #tpu.memory_space<vmem>>, vector<64x64xf32>
    %c0_3 = arith.constant 0 : index
    %c0_4 = arith.constant 0 : index
    %3 = vector.load %arg2[%c0_3, %c0_4] : memref<1152x128xf32, #tpu.memory_space<vmem>>, vector<128x128xf32>
    %cst_5 = arith.constant dense<0.000000e+00> : vector<64x128xf32>
    %4 = tpu.matmul %2, %0, %cst_5 {dimension_numbers = #tpu.dot_dimension_numbers<[1], [0], [0], [1], [0, 0, 1, 1], [], []>} : vector<64x64xf32>, vector<64x128xf32>, vector<64x128xf32> -> vector<64x128xf32>
    %cst_6 = arith.constant dense<0.000000e+00> : vector<64x128xf32>
    %5 = tpu.matmul %4, %3, %cst_6 {dimension_numbers = #tpu.dot_dimension_numbers<[1], [0], [0], [1], [0, 0, 1, 1], [], []>} : vector<64x128xf32>, vector<128x128xf32>, vector<64x128xf32> -> vector<64x128xf32>
    %6 = arith.addf %1, %5 : vector<64x128xf32>
    %c64 = arith.constant 64 : index
    %c0_7 = arith.constant 0 : index
    %7 = vector.load %arg1[%c64, %c0_7] : memref<576x64xf32, #tpu.memory_space<vmem>>, vector<64x64xf32>
    %c128 = arith.constant 128 : index
    %c0_8 = arith.constant 0 : index
    %8 = vector.load %arg2[%c128, %c0_8] : memref<1152x128xf32, #tpu.memory_space<vmem>>, vector<128x128xf32>
    %cst_9 = arith.constant dense<0.000000e+00> : vector<64x128xf32>
    %9 = tpu.matmul %7, %0, %cst_9 {dimension_numbers = #tpu.dot_dimension_numbers<[1], [0], [0], [1], [0, 0, 1, 1], [], []>} : vector<64x64xf32>, vector<64x128xf32>, vector<64x128xf32> -> vector<64x128xf32>
    %cst_10 = arith.constant dense<0.000000e+00> : vector<64x128xf32>
    %10 = tpu.matmul %9, %8, %cst_10 {dimension_numbers = #tpu.dot_dimension_numbers<[1], [0], [0], [1], [0, 0, 1, 1], [], []>} : vector<64x128xf32>, vector<128x128xf32>, vector<64x128xf32> -> vector<64x128xf32>
    %11 = arith.addf %6, %10 : vector<64x128xf32>
    %c128_11 = arith.constant 128 : index
    %c0_12 = arith.constant 0 : index
    %12 = vector.load %arg1[%c128_11, %c0_12] : memref<576x64xf32, #tpu.memory_space<vmem>>, vector<64x64xf32>
    %c256 = arith.constant 256 : index
    %c0_13 = arith.constant 0 : index
    %13 = vector.load %arg2[%c256, %c0_13] : memref<1152x128xf32, #tpu.memory_space<vmem>>, vector<128x128xf32>
    %cst_14 = arith.constant dense<0.000000e+00> : vector<64x128xf32>
    %14 = tpu.matmul %12, %0, %cst_14 {dimension_numbers = #tpu.dot_dimension_numbers<[1], [0], [0], [1], [0, 0, 1, 1], [], []>} : vector<64x64xf32>, vector<64x128xf32>, vector<64x128xf32> -> vector<64x128xf32>
    %cst_15 = arith.constant dense<0.000000e+00> : vector<64x128xf32>
    %15 = tpu.matmul %14, %13, %cst_15 {dimension_numbers = #tpu.dot_dimension_numbers<[1], [0], [0], [1], [0, 0, 1, 1], [], []>} : vector<64x128xf32>, vector<128x128xf32>, vector<64x128xf32> -> vector<64x128xf32>
    %16 = arith.addf %11, %15 : vector<64x128xf32>
    %c192 = arith.constant 192 : index
    %c0_16 = arith.constant 0 : index
    %17 = vector.load %arg1[%c192, %c0_16] : memref<576x64xf32, #tpu.memory_space<vmem>>, vector<64x64xf32>
    %c384 = arith.constant 384 : index
    %c0_17 = arith.constant 0 : index
    %18 = vector.load %arg2[%c384, %c0_17] : memref<1152x128xf32, #tpu.memory_space<vmem>>, vector<128x128xf32>
    %cst_18 = arith.constant dense<0.000000e+00> : vector<64x128xf32>
    %19 = tpu.matmul %17, %0, %cst_18 {dimension_numbers = #tpu.dot_dimension_numbers<[1], [0], [0], [1], [0, 0, 1, 1], [], []>} : vector<64x64xf32>, vector<64x128xf32>, vector<64x128xf32> -> vector<64x128xf32>
    %cst_19 = arith.constant dense<0.000000e+00> : vector<64x128xf32>
    %20 = tpu.matmul %19, %18, %cst_19 {dimension_numbers = #tpu.dot_dimension_numbers<[1], [0], [0], [1], [0, 0, 1, 1], [], []>} : vector<64x128xf32>, vector<128x128xf32>, vector<64x128xf32> -> vector<64x128xf32>
    %21 = arith.addf %16, %20 : vector<64x128xf32>
    %c256_20 = arith.constant 256 : index
    %c0_21 = arith.constant 0 : index
    %22 = vector.load %arg1[%c256_20, %c0_21] : memref<576x64xf32, #tpu.memory_space<vmem>>, vector<64x64xf32>
    %c512 = arith.constant 512 : index
    %c0_22 = arith.constant 0 : index
    %23 = vector.load %arg2[%c512, %c0_22] : memref<1152x128xf32, #tpu.memory_space<vmem>>, vector<128x128xf32>
    %cst_23 = arith.constant dense<0.000000e+00> : vector<64x128xf32>
    %24 = tpu.matmul %22, %0, %cst_23 {dimension_numbers = #tpu.dot_dimension_numbers<[1], [0], [0], [1], [0, 0, 1, 1], [], []>} : vector<64x64xf32>, vector<64x128xf32>, vector<64x128xf32> -> vector<64x128xf32>
    %cst_24 = arith.constant dense<0.000000e+00> : vector<64x128xf32>
    %25 = tpu.matmul %24, %23, %cst_24 {dimension_numbers = #tpu.dot_dimension_numbers<[1], [0], [0], [1], [0, 0, 1, 1], [], []>} : vector<64x128xf32>, vector<128x128xf32>, vector<64x128xf32> -> vector<64x128xf32>
    %26 = arith.addf %21, %25 : vector<64x128xf32>
    %c320 = arith.constant 320 : index
    %c0_25 = arith.constant 0 : index
    %27 = vector.load %arg1[%c320, %c0_25] : memref<576x64xf32, #tpu.memory_space<vmem>>, vector<64x64xf32>
    %c640 = arith.constant 640 : index
    %c0_26 = arith.constant 0 : index
    %28 = vector.load %arg2[%c640, %c0_26] : memref<1152x128xf32, #tpu.memory_space<vmem>>, vector<128x128xf32>
    %cst_27 = arith.constant dense<0.000000e+00> : vector<64x128xf32>
    %29 = tpu.matmul %27, %0, %cst_27 {dimension_numbers = #tpu.dot_dimension_numbers<[1], [0], [0], [1], [0, 0, 1, 1], [], []>} : vector<64x64xf32>, vector<64x128xf32>, vector<64x128xf32> -> vector<64x128xf32>
    %cst_28 = arith.constant dense<0.000000e+00> : vector<64x128xf32>
    %30 = tpu.matmul %29, %28, %cst_28 {dimension_numbers = #tpu.dot_dimension_numbers<[1], [0], [0], [1], [0, 0, 1, 1], [], []>} : vector<64x128xf32>, vector<128x128xf32>, vector<64x128xf32> -> vector<64x128xf32>
    %31 = arith.addf %26, %30 : vector<64x128xf32>
    %c384_29 = arith.constant 384 : index
    %c0_30 = arith.constant 0 : index
    %32 = vector.load %arg1[%c384_29, %c0_30] : memref<576x64xf32, #tpu.memory_space<vmem>>, vector<64x64xf32>
    %c768 = arith.constant 768 : index
    %c0_31 = arith.constant 0 : index
    %33 = vector.load %arg2[%c768, %c0_31] : memref<1152x128xf32, #tpu.memory_space<vmem>>, vector<128x128xf32>
    %cst_32 = arith.constant dense<0.000000e+00> : vector<64x128xf32>
    %34 = tpu.matmul %32, %0, %cst_32 {dimension_numbers = #tpu.dot_dimension_numbers<[1], [0], [0], [1], [0, 0, 1, 1], [], []>} : vector<64x64xf32>, vector<64x128xf32>, vector<64x128xf32> -> vector<64x128xf32>
    %cst_33 = arith.constant dense<0.000000e+00> : vector<64x128xf32>
    %35 = tpu.matmul %34, %33, %cst_33 {dimension_numbers = #tpu.dot_dimension_numbers<[1], [0], [0], [1], [0, 0, 1, 1], [], []>} : vector<64x128xf32>, vector<128x128xf32>, vector<64x128xf32> -> vector<64x128xf32>
    %36 = arith.addf %31, %35 : vector<64x128xf32>
    %c448 = arith.constant 448 : index
    %c0_34 = arith.constant 0 : index
    %37 = vector.load %arg1[%c448, %c0_34] : memref<576x64xf32, #tpu.memory_space<vmem>>, vector<64x64xf32>
    %c896 = arith.constant 896 : index
    %c0_35 = arith.constant 0 : index
    %38 = vector.load %arg2[%c896, %c0_35] : memref<1152x128xf32, #tpu.memory_space<vmem>>, vector<128x128xf32>
    %cst_36 = arith.constant dense<0.000000e+00> : vector<64x128xf32>
    %39 = tpu.matmul %37, %0, %cst_36 {dimension_numbers = #tpu.dot_dimension_numbers<[1], [0], [0], [1], [0, 0, 1, 1], [], []>} : vector<64x64xf32>, vector<64x128xf32>, vector<64x128xf32> -> vector<64x128xf32>
    %cst_37 = arith.constant dense<0.000000e+00> : vector<64x128xf32>
    %40 = tpu.matmul %39, %38, %cst_37 {dimension_numbers = #tpu.dot_dimension_numbers<[1], [0], [0], [1], [0, 0, 1, 1], [], []>} : vector<64x128xf32>, vector<128x128xf32>, vector<64x128xf32> -> vector<64x128xf32>
    %41 = arith.addf %36, %40 : vector<64x128xf32>
    %c512_38 = arith.constant 512 : index
    %c0_39 = arith.constant 0 : index
    %42 = vector.load %arg1[%c512_38, %c0_39] : memref<576x64xf32, #tpu.memory_space<vmem>>, vector<64x64xf32>
    %c1024 = arith.constant 1024 : index
    %c0_40 = arith.constant 0 : index
    %43 = vector.load %arg2[%c1024, %c0_40] : memref<1152x128xf32, #tpu.memory_space<vmem>>, vector<128x128xf32>
    %cst_41 = arith.constant dense<0.000000e+00> : vector<64x128xf32>
    %44 = tpu.matmul %42, %0, %cst_41 {dimension_numbers = #tpu.dot_dimension_numbers<[1], [0], [0], [1], [0, 0, 1, 1], [], []>} : vector<64x64xf32>, vector<64x128xf32>, vector<64x128xf32> -> vector<64x128xf32>
    %cst_42 = arith.constant dense<0.000000e+00> : vector<64x128xf32>
    %45 = tpu.matmul %44, %43, %cst_42 {dimension_numbers = #tpu.dot_dimension_numbers<[1], [0], [0], [1], [0, 0, 1, 1], [], []>} : vector<64x128xf32>, vector<128x128xf32>, vector<64x128xf32> -> vector<64x128xf32>
    %46 = arith.addf %41, %45 : vector<64x128xf32>
    %cst_43 = arith.constant dense<0.000000e+00> : vector<128xf32>
    %47 = vector.multi_reduction <add>, %46, %cst_43 [0] : vector<64x128xf32> to vector<128xf32>
    %48 = vector.shape_cast %47 : vector<128xf32> to vector<1x128xf32>
    %cst_44 = arith.constant 6.400000e+01 : f32
    %49 = vector.broadcast %cst_44 : f32 to vector<1x128xf32>
    %50 = arith.divf %48, %49 : vector<1x128xf32>
    %51 = vector.broadcast %50 : vector<1x128xf32> to vector<64x128xf32>
    %52 = arith.subf %46, %51 : vector<64x128xf32>
    %53 = arith.mulf %52, %52 : vector<64x128xf32>
    %cst_45 = arith.constant dense<0.000000e+00> : vector<128xf32>
    %54 = vector.multi_reduction <add>, %53, %cst_45 [0] : vector<64x128xf32> to vector<128xf32>
    %55 = vector.shape_cast %54 : vector<128xf32> to vector<1x128xf32>
    %cst_46 = arith.constant 6.400000e+01 : f32
    %56 = vector.broadcast %cst_46 : f32 to vector<1x128xf32>
    %57 = arith.divf %55, %56 : vector<1x128xf32>
    %58 = vector.broadcast %50 : vector<1x128xf32> to vector<64x128xf32>
    %59 = arith.subf %46, %58 : vector<64x128xf32>
    %cst_47 = arith.constant 9.99999974E-6 : f32
    %60 = vector.broadcast %cst_47 : f32 to vector<1x128xf32>
    %61 = arith.addf %57, %60 : vector<1x128xf32>
    %62 = math.rsqrt %61 : vector<1x128xf32>
    %63 = vector.broadcast %62 : vector<1x128xf32> to vector<64x128xf32>
    %64 = arith.mulf %59, %63 : vector<64x128xf32>
    %c0_48 = arith.constant 0 : index
    %c0_49 = arith.constant 0 : index
    %65 = vector.load %arg3[%c0_48, %c0_49] : memref<1x128xf32, #tpu.memory_space<vmem>>, vector<1x128xf32>
    %66 = vector.broadcast %65 : vector<1x128xf32> to vector<64x128xf32>
    %67 = arith.mulf %64, %66 : vector<64x128xf32>
    %c0_50 = arith.constant 0 : index
    %c0_51 = arith.constant 0 : index
    %68 = vector.load %arg4[%c0_50, %c0_51] : memref<1x128xf32, #tpu.memory_space<vmem>>, vector<1x128xf32>
    %69 = vector.broadcast %68 : vector<1x128xf32> to vector<64x128xf32>
    %70 = arith.addf %67, %69 : vector<64x128xf32>
    %cst_52 = arith.constant 0.000000e+00 : f32
    %71 = vector.broadcast %cst_52 : f32 to vector<64x128xf32>
    %72 = arith.cmpf oge, %70, %71 : vector<64x128xf32>
    %cst_53 = arith.constant 2.000000e-01 : f32
    %73 = vector.broadcast %cst_53 : f32 to vector<64x128xf32>
    %74 = arith.mulf %73, %70 : vector<64x128xf32>
    %75 = arith.select %72, %70, %74 : vector<64x128xi1>, vector<64x128xf32>
    %c0_54 = arith.constant 0 : index
    %c0_55 = arith.constant 0 : index
    %76 = vector.load %arg5[%c0_54, %c0_55] : memref<16x128xf32, #tpu.memory_space<vmem>>, vector<16x128xf32>
    %77 = tpu.concatenate %76, %76, %76, %76 in 0 : vector<16x128xf32>, vector<16x128xf32>, vector<16x128xf32>, vector<16x128xf32> -> vector<64x128xf32>
    %c0_56 = arith.constant 0 : index
    %c0_57 = arith.constant 0 : index
    %78 = vector.load %arg6[%c0_56, %c0_57] : memref<4x64xf32, #tpu.memory_space<vmem>>, vector<4x64xf32>
    %79 = arith.mulf %75, %77 : vector<64x128xf32>
    %cst_58 = arith.constant dense<0.000000e+00> : vector<4x128xf32>
    %80 = tpu.matmul %78, %79, %cst_58 {dimension_numbers = #tpu.dot_dimension_numbers<[1], [0], [0], [1], [0, 0, 1, 1], [], []>} : vector<4x64xf32>, vector<64x128xf32>, vector<4x128xf32> -> vector<4x128xf32>
    %cst_59 = arith.constant dense<0.000000e+00> : vector<4xf32>
    %81 = vector.multi_reduction <add>, %80, %cst_59 [1] : vector<4x128xf32> to vector<4xf32>
    %82 = vector.shape_cast %81 : vector<4xf32> to vector<4x1xf32>
    %c0_60 = arith.constant 0 : index
    %c0_61 = arith.constant 0 : index
    %83 = vector.load %arg7[%c0_60, %c0_61] : memref<1x1xf32, #tpu.memory_space<vmem>>, vector<1x1xf32>
    %84 = vector.extract %83[0, 0] : f32 from vector<1x1xf32>
    %85 = vector.broadcast %84 : f32 to vector<4x1xf32>
    %86 = arith.addf %82, %85 : vector<4x1xf32>
    %87 = arith.negf %86 : vector<4x1xf32>
    %88 = math.exp %87 : vector<4x1xf32>
    %cst_62 = arith.constant 1.000000e+00 : f32
    %89 = vector.broadcast %cst_62 : f32 to vector<4x1xf32>
    %90 = arith.addf %89, %88 : vector<4x1xf32>
    %91 = arith.divf %89, %90 : vector<4x1xf32>
    %c0_63 = arith.constant 0 : index
    %c0_64 = arith.constant 0 : index
    %92 = vector.load %arg8[%c0_63, %c0_64] : memref<4x1xf32, #tpu.memory_space<vmem>>, vector<4x1xf32>
    tpu.vector_store %arg8[%c0_63, %c0_64], %91 {strides = array<i32>} : memref<4x1xf32, #tpu.memory_space<vmem>>, vector<4x1xf32>,
    return
  }
}

</mosaic_0001>

<bundles_post_ra>
// kernel: d_get_logits.1
= control target key start
LH: loop header
LB: loop body
LE: loop exit
PB: predicated region body
PF: predicated region fallthrough
CT: control target
= control target key end

     0   :  { %vm63_vm0 = vcmask 523264   ;;  %vm4263_vm1 = vmmov 0   ;;  %vm2611_vm10 = vcmask 1043456   ;;  %vm2625_vm11 = vcmask 3072   ;;  %s5311_s0 = inlined_call_operand.vmem [shape: f32[64,128], index: 0, kind: input, shape index: {}]   ;;  %s5312_s1 = inlined_call_operand.vmem [shape: f32[576,64], index: 1, kind: input, shape index: {}]   ;;  %s5313_s2 = inlined_call_operand.vmem [shape: f32[1152,128], index: 2, kind: input, shape index: {}]   ;;  %s5314_s3 = inlined_call_operand.vmem [shape: f32[1,128], index: 3, kind: input, shape index: {}]   ;;  %s5315_s4 = inlined_call_operand.vmem [shape: f32[1,128], index: 4, kind: input, shape index: {}]   ;;  %s5316_s5 = inlined_call_operand.vmem [shape: f32[16,128], index: 5, kind: input, shape index: {}]   ;;  %s5317_s6 = inlined_call_operand.vmem [shape: f32[4,64], index: 6, kind: input, shape index: {}]   ;;  %s5318_s7 = inlined_call_operand.<no memory space> [shape: f32[1,1], index: 7, kind: input, shape index: {}]   ;;  %s5319_s8 = inlined_call_operand.vmem [shape: f32[4,1], index: 8, kind: output, shape index: {}]  }
   0x1   :  { %v31_v0 = vld [vmem:[%s5311_s0] sm:$0xff]  ;;  %v32_v1 = vld [vmem:[%s5311_s0 + $0x8] sm:$0xff]  ;;  %v33_v2 = vld [vmem:[%s5311_s0 + $0x10] sm:$0xff] }
   0x2   :  { %v4319_v3 = vpack.c.bf16 %v32_v1, %v31_v0  ;;  %v34_v4 = vld [vmem:[%s5311_s0 + $0x18] sm:$0xff]  ;;  %v35_v6 = vld [vmem:[%s5311_s0 + $0x20] sm:$0xff]  ;;  %v36_v7 = vld [vmem:[%s5311_s0 + $0x28] sm:$0xff] }
   0x3   :  { %v4324_v5 = vpack.c.bf16 %v34_v4, %v33_v2  ;;  %v39_v8 = vld [vmem:[%s5312_s1] sm:$0xff]  ;;  %v4339_v9 = vpack.c.bf16 %v36_v7, %v35_v6  ;;  %v37_v10 = vld [vmem:[%s5311_s0 + $0x30] sm:$0xff]  ;;  %v38_v11 = vld [vmem:[%s5311_s0 + $0x38] sm:$0xff] }
   0x4   :  { %3744 = vmatprep.subr.bf16.mxu1 %v4319_v3  ;;  %3092 = vmatprep.mubr.msk.f32.mxu1 %vm63_vm0, %v39_v8  ;;  %v4349_v12 = vpack.c.bf16 %v38_v11, %v37_v10  ;;  %v40_v13 = vld [vmem:[%s5312_s1 + $0x8] sm:$0xff]  ;;  %v41_v14 = vld [vmem:[%s5312_s1 + $0x10] sm:$0xff]  ;;  %v42_v15 = vld [vmem:[%s5312_s1 + $0x18] sm:$0xff] }
   0x5   :  { %3746 = vmatpush3.bf16.msra.mxu1 %v4319_v3  ;;  %v43_v16 = vld [vmem:[%s5312_s1 + $0x20] sm:$0xff]  ;;  %v44_v17 = vld [vmem:[%s5312_s1 + $0x28] sm:$0xff]  ;;  %v45_v18 = vld [vmem:[%s5312_s1 + $0x30] sm:$0xff] }
   0x6   :  { %3748 = vmatprep.subr.bf16.mxu1 %v4324_v5  ;;  %v201_v19 = vld [vmem:[%s5313_s2 + $0x80] sm:$0xff]  ;;  %v202_v20 = vld [vmem:[%s5313_s2 + $0x88] sm:$0xff]  ;;  %v46_v21 = vld [vmem:[%s5312_s1 + $0x38] sm:$0xff] }
   0x7   :  { %v193_v22 = vld [vmem:[%s5312_s1 + $0x40] sm:$0xff]  ;;  %v3775_v23 = vpack.c.bf16 %v202_v20, %v201_v19  ;;  %v203_v24 = vld [vmem:[%s5313_s2 + $0x90] sm:$0xff]  ;;  %v204_v25 = vld [vmem:[%s5313_s2 + $0x98] sm:$0xff] }
   0x8   :  { %v194_v26 = vld [vmem:[%s5312_s1 + $0x48] sm:$0xff]  ;;  %v195_v27 = vld [vmem:[%s5312_s1 + $0x50] sm:$0xff]  ;;  %v3779_v28 = vpack.c.bf16 %v204_v25, %v203_v24  ;;  %v205_v29 = vld [vmem:[%s5313_s2 + $0xa0] sm:$0xff] }
   0x9   :  { %3750 = vmatpush3.bf16.msra.mxu1 %v4324_v5  ;;  %v206_v30 = vld [vmem:[%s5313_s2 + $0xa8] sm:$0xff]  ;;  %v196_v31 = vld [vmem:[%s5312_s1 + $0x58] sm:$0xff]  ;;  %v197_v32 = vld [vmem:[%s5312_s1 + $0x60] sm:$0xff] }
   0xa   :  { %3752 = vmatprep.subr.bf16.mxu1 %v4339_v9  ;;  %v3783_v33 = vpack.c.bf16 %v206_v30, %v205_v29  ;;  %v207_v34 = vld [vmem:[%s5313_s2 + $0xb0] sm:$0xff]  ;;  %v208_v35 = vld [vmem:[%s5313_s2 + $0xb8] sm:$0xff]  ;;  %v198_v36 = vld [vmem:[%s5312_s1 + $0x68] sm:$0xff] }
   0xb   :  { %v199_v37 = vld [vmem:[%s5312_s1 + $0x70] sm:$0xff]  ;;  %v3787_v38 = vpack.c.bf16 %v208_v35, %v207_v34  ;;  %v200_v39 = vld [vmem:[%s5312_s1 + $0x78] sm:$0xff]  ;;  %v209_v40 = vld [vmem:[%s5313_s2 + $0xc0] sm:$0xff] }
   0xc   :  { %v210_v41 = vld [vmem:[%s5313_s2 + $0xc8] sm:$0xff]  ;;  %v211_v43 = vld [vmem:[%s5313_s2 + $0xd0] sm:$0xff]  ;;  %v212_v44 = vld [vmem:[%s5313_s2 + $0xd8] sm:$0xff] }
   0xd   :  { %3754 = vmatpush3.bf16.msra.mxu1 %v4339_v9  ;;  %v3791_v42 = vpack.c.bf16 %v210_v41, %v209_v40  ;;  %v3795_v45 = vpack.c.bf16 %v212_v44, %v211_v43  ;;  %v213_v46 = vld [vmem:[%s5313_s2 + $0xe0] sm:$0xff]  ;;  %v214_v47 = vld [vmem:[%s5313_s2 + $0xe8] sm:$0xff]  ;;  %v215_v49 = vld [vmem:[%s5313_s2 + $0xf0] sm:$0xff] }
   0xe   :  { %3756 = vmatprep.subr.bf16.mxu1 %v4349_v12  ;;  %v3799_v48 = vpack.c.bf16 %v214_v47, %v213_v46  ;;  %v216_v50 = vld [vmem:[%s5313_s2 + $0xf8] sm:$0xff]  ;;  %v47_v52 = vld [vmem:[%s5313_s2] sm:$0xff]  ;;  %v48_v53 = vld [vmem:[%s5313_s2 + $0x8] sm:$0xff] }
   0xf   :  { %v3803_v51 = vpack.c.bf16 %v216_v50, %v215_v49  ;;  %v3807_v54 = vpack.c.bf16 %v48_v53, %v47_v52  ;;  %v49_v63 = vld [vmem:[%s5313_s2 + $0x10] sm:$0xff]  ;;  %v50_v0 = vld [vmem:[%s5313_s2 + $0x18] sm:$0xff]  ;;  %v51_v6 = vld [vmem:[%s5313_s2 + $0x20] sm:$0xff] }
  0x10   :  { %v3811_v4 = vpack.c.bf16 %v50_v0, %v49_v63  ;;  %v52_v7 = vld [vmem:[%s5313_s2 + $0x28] sm:$0xff]  ;;  %v566_v24 = vld [vmem:[%s5313_s2 + $0x110] sm:$0xff]  ;;  %v567_v25 = vld [vmem:[%s5313_s2 + $0x118] sm:$0xff] }
  0x11   :  { %3758 = vmatpush3.bf16.msra.mxu1 %v4349_v12  ;;  %v3815_v11 = vpack.c.bf16 %v52_v7, %v51_v6  ;;  %v57_v29 = vld [vmem:[%s5313_s2 + $0x50] sm:$0xff]  ;;  %v58_v30 = vld [vmem:[%s5313_s2 + $0x58] sm:$0xff]  ;;  %v59_v35 = vld [vmem:[%s5313_s2 + $0x60] sm:$0xff] }
  0x12   :  { %3760 = vmatprep.subr.bf16.mxu1 %v4319_v3  ;;  %v61_v41 = vld [vmem:[%s5313_s2 + $0x70] sm:$0xff]  ;;  %v556_v44 = vld [vmem:[%s5312_s1 + $0x80] sm:$0xff]  ;;  %v559_v47 = vld [vmem:[%s5312_s1 + $0x98] sm:$0xff] }
  0x13   :  { %v558_v46 = vld [vmem:[%s5312_s1 + $0x90] sm:$0xff]  ;;  %v561_v49 = vld [vmem:[%s5312_s1 + $0xa8] sm:$0xff]  ;;  %v822_v52 = vld [vmem:[%s5312_s1 + $0xc0] sm:$0xff] }
  0x14   :  { %3093 = vmatmul.mubr.msk.f32.vlgmr.msra.gmra.mrb[0].mxu1 %vm63_vm0, %v40_v13  ;;  %v53_v13 = vld [vmem:[%s5313_s2 + $0x30] sm:$0xff]  ;;  %v823_v53 = vld [vmem:[%s5312_s1 + $0xc8] sm:$0xff]  ;;  %v1091_v63 = vld [vmem:[%s5312_s1 + $0x118] sm:$0xff] }
  0x15   :  { %3762 = vmatpush3.bf16.msra.mxu1 %v4319_v3  ;;  %3095 = vmatprep.mubr.msk.f32.mxu1 %vm63_vm0, %v41_v14  ;;  %v54_v14 = vld [vmem:[%s5313_s2 + $0x38] sm:$0xff]  ;;  %v562_v50 = vld [vmem:[%s5312_s1 + $0xb0] sm:$0xff]  ;;  %v1092_v0 = vld [vmem:[%s5312_s1 + $0x120] sm:$0xff] }
  0x16   :  { %3764 = vmatprep.subr.bf16.mxu1 %v4324_v5  ;;  %v3819_v19 = vpack.c.bf16 %v54_v14, %v53_v13  ;;  %v1354_v6 = vld [vmem:[%s5312_s1 + $0x140] sm:$0xff]  ;;  %v1355_v7 = vld [vmem:[%s5312_s1 + $0x148] sm:$0xff]  ;;  %v1360_v14 = vld [vmem:[%s5312_s1 + $0x170] sm:$0xff] }
  0x17   :  { %v1359_v13 = vld [vmem:[%s5312_s1 + $0x168] sm:$0xff] }
  0x18   :  { %3096 = vmatmul.mubr.msk.f32.gmra.mrb[2].mxu1 %vm63_vm0, %v42_v15 }
  0x19   :  { %3766 = vmatpush3.bf16.msra.mxu1 %v4324_v5  ;;  %3098 = vmatprep.mubr.msk.f32.mxu1 %vm63_vm0, %v43_v16  ;;  %v564_v16 = vld [vmem:[%s5313_s2 + $0x100] sm:$0xff] }
  0x1a   :  { %3768 = vmatprep.subr.bf16.mxu1 %v4339_v9 }
  0x1c   :  { %3099 = vmatmul.mubr.msk.f32.gmra.mrb[4].mxu1 %vm63_vm0, %v44_v17  ;;  %v565_v17 = vld [vmem:[%s5313_s2 + $0x108] sm:$0xff] }
  0x1d   :  { %3770 = vmatpush3.bf16.msra.mxu1 %v4339_v9  ;;  %3101 = vmatprep.mubr.msk.f32.mxu1 %vm63_vm0, %v45_v18  ;;  %v3855_v20 = vpack.c.bf16 %v565_v17, %v564_v16  ;;  %v1620_v16 = vld [vmem:[%s5312_s1 + $0x180] sm:$0xff]  ;;  %v1621_v17 = vld [vmem:[%s5312_s1 + $0x188] sm:$0xff] }
  0x1e   :  { %3772 = vmatprep.subr.bf16.mxu1 %v4349_v12 }
  0x1f   :  { %3856 = vmatprep.subr.bf16.mxu0 %v3855_v20 }
  0x20   :  { %3102 = vmatmul.mubr.msk.f32.gmra.mrb[6].mxu1 %vm63_vm0, %v46_v21  ;;  %v55_v21 = vld [vmem:[%s5313_s2 + $0x40] sm:$0xff]  ;;  %3858 = vmatpush3.bf16.msra.mxu0 %v3855_v20 }
  0x21   :  { %3774 = vmatpush3.bf16.msra.mxu1 %v4349_v12  ;;  %3120 = vmatprep.mubr.msk.f32.mxu1 %vm63_vm0, %v193_v22  ;;  %v56_v22 = vld [vmem:[%s5313_s2 + $0x48] sm:$0xff]  ;;  %v1624_v20 = vld [vmem:[%s5312_s1 + $0x1a0] sm:$0xff] }
  0x22   :  { %3776 = vmatprep.subr.bf16.mxu1 %v3775_v23 }
  0x24   :  { %3121 = vmatmul.mubr.msk.f32.vlgmr.msra.gmra.mrb[8].mxu1 %vm63_vm0, %v194_v26 }
  0x25   :  { %3123 = vmatprep.mubr.msk.f32.mxu1 %vm63_vm0, %v195_v27  ;;  %3778 = vmatpush3.bf16.msra.mxu1 %v3775_v23  ;;  %v3823_v27 = vpack.c.bf16 %v56_v22, %v55_v21  ;;  %v572_v21 = vld [vmem:[%s5313_s2 + $0x140] sm:$0xff]  ;;  %v573_v22 = vld [vmem:[%s5313_s2 + $0x148] sm:$0xff] }
  0x26   :  { %3780 = vmatprep.subr.bf16.mxu1 %v3779_v28 }
  0x28   :  { %3124 = vmatmul.mubr.msk.f32.gmra.mrb[10].mxu1 %vm63_vm0, %v196_v31  ;;  %v568_v31 = vld [vmem:[%s5313_s2 + $0x120] sm:$0xff] }
  0x29   :  { %3126 = vmatprep.mubr.msk.f32.mxu1 %vm63_vm0, %v197_v32  ;;  %3782 = vmatpush3.bf16.msra.mxu1 %v3779_v28  ;;  %v3859_v28 = vpack.c.bf16 %v567_v25, %v566_v24  ;;  %v569_v32 = vld [vmem:[%s5313_s2 + $0x128] sm:$0xff]  ;;  %v1626_v25 = vld [vmem:[%s5312_s1 + $0x1b0] sm:$0xff] }
  0x2a   :  { %3784 = vmatprep.subr.bf16.mxu1 %v3783_v33  ;;  %v3863_v34 = vpack.c.bf16 %v569_v32, %v568_v31  ;;  %v1625_v24 = vld [vmem:[%s5312_s1 + $0x1a8] sm:$0xff]  ;;  %v576_v31 = vld [vmem:[%s5313_s2 + $0x160] sm:$0xff] }
  0x2b   :  { %3860 = vmatprep.subr.bf16.mxu0 %v3859_v28  ;;  %v577_v32 = vld [vmem:[%s5313_s2 + $0x168] sm:$0xff] }
  0x2c   :  { %3127 = vmatmul.mubr.msk.f32.gmra.mrb[12].mxu1 %vm63_vm0, %v198_v36  ;;  %3862 = vmatpush3.bf16.msra.mxu0 %v3859_v28  ;;  %v60_v36 = vld [vmem:[%s5313_s2 + $0x68] sm:$0xff] }
  0x2d   :  { %3129 = vmatprep.mubr.msk.f32.mxu1 %vm63_vm0, %v199_v37  ;;  %3786 = vmatpush3.bf16.msra.mxu1 %v3783_v33  ;;  %v3827_v33 = vpack.c.bf16 %v58_v30, %v57_v29  ;;  %v570_v37 = vld [vmem:[%s5313_s2 + $0x130] sm:$0xff]  ;;  %v3831_v40 = vpack.c.bf16 %v60_v36, %v59_v35  ;;  %v1627_v29 = vld [vmem:[%s5312_s1 + $0x1b8] sm:$0xff]  ;;  %v1886_v30 = vld [vmem:[%s5312_s1 + $0x1c0] sm:$0xff] }
  0x2e   :  { %3788 = vmatprep.subr.bf16.mxu1 %v3787_v38  ;;  %3864 = vmatprep.subr.bf16.mxu0 %v3863_v34  ;;  %v1888_v35 = vld [vmem:[%s5312_s1 + $0x1d0] sm:$0xff] }
  0x2f   :  { %v578_v36 = vld [vmem:[%s5313_s2 + $0x170] sm:$0xff] }
  0x30   :  { %3130 = vmatmul.mubr.msk.f32.gmra.mrb[14].mxu1 %vm63_vm0, %v200_v39  ;;  %3866 = vmatpush3.bf16.msra.mxu0 %v3863_v34  ;;  %v1887_v34 = vld [vmem:[%s5312_s1 + $0x1c8] sm:$0xff] }
  0x31   :  { %3790 = vmatpush3.bf16.msra.mxu1 %v3787_v38  ;;  %v571_v38 = vld [vmem:[%s5313_s2 + $0x138] sm:$0xff] }
  0x32   :  { %3792 = vmatprep.subr.bf16.mxu1 %v3791_v42  ;;  %v3867_v39 = vpack.c.bf16 %v571_v38, %v570_v37  ;;  %v579_v37 = vld [vmem:[%s5313_s2 + $0x178] sm:$0xff] }
  0x33   :  { %v3883_v38 = vpack.c.bf16 %v579_v37, %v578_v36 }
  0x34   :  { %3868 = vmatprep.subr.bf16.mxu0 %v3867_v39 }
  0x35   :  { %3794 = vmatpush3.bf16.msra.mxu1 %v3791_v42  ;;  %v62_v42 = vld [vmem:[%s5313_s2 + $0x78] sm:$0xff]  ;;  %3870 = vmatpush3.bf16.msra.mxu0 %v3867_v39 }
  0x36   :  { %3796 = vmatprep.subr.bf16.mxu1 %v3795_v45  ;;  %v3835_v43 = vpack.c.bf16 %v62_v42, %v61_v41  ;;  %v1889_v39 = vld [vmem:[%s5312_s1 + $0x1d8] sm:$0xff]  ;;  %v830_v41 = vld [vmem:[%s5313_s2 + $0x180] sm:$0xff] }
  0x39   :  { %3798 = vmatpush3.bf16.msra.mxu1 %v3795_v45  ;;  %v557_v45 = vld [vmem:[%s5312_s1 + $0x88] sm:$0xff] }
  0x3a   :  { %3800 = vmatprep.subr.bf16.mxu1 %v3799_v48 }
  0x3d   :  { %3802 = vmatpush3.bf16.msra.mxu1 %v3799_v48  ;;  %v560_v48 = vld [vmem:[%s5312_s1 + $0xa0] sm:$0xff] }
  0x3e   :  { %3804 = vmatprep.subr.bf16.mxu1 %v3803_v51 }
  0x41   :  { %3806 = vmatpush3.bf16.msra.mxu1 %v3803_v51  ;;  %v563_v51 = vld [vmem:[%s5312_s1 + $0xb8] sm:$0xff] }
  0x42   :  { %3808 = vmatprep.subr.bf16.mxu1 %v3807_v54 }
  0xe7   :  { %v4476_v55 = vpop.f32.mrb[0].mxu1 }
  0xe8   :  { %v154_v56 = vpop.f32.mrb[1].mxu1 }
  0xeb   :  { %v4478_v57 = vpop.f32.mrb[2].mxu1 }
  0xec   :  { %v4480_v58 = vpop.f32.mrb[3].mxu1 }
  0xef   :  { %v4482_v59 = vpop.f32.mrb[4].mxu1 }
  0xf0   :  { %v4484_v60 = vpop.f32.mrb[5].mxu1 }
  0xf3   :  { %v4486_v61 = vpop.f32.mrb[6].mxu1 }
  0xf4   :  { %v4488_v62 = vpop.f32.mrb[7].mxu1 }
  0xf7   :  { %v3122_v1 = vpop.f32.mrb[8].mxu1 }
  0xf8   :  { %v307_v2 = vpop.f32.mrb[9].mxu1 }
  0xf9   :  { %3164 = vmatprep.mubr.f32.mxu1 %v307_v2  ;;  %v1094_v2 = vld [vmem:[%s5312_s1 + $0x130] sm:$0xff] }
  0xfa   :  { %3165 = vmatmul.mubr.f32.vlgmr.msra.gmra.mrb[16].mxu1 %v3122_v1  ;;  %v1093_v1 = vld [vmem:[%s5312_s1 + $0x128] sm:$0xff] }
  0xfb   :  { %3810 = vmatpush3.bf16.msra.mxu1 %v3807_v54  ;;  %v3125_v8 = vpop.f32.mrb[10].mxu1  ;;  %v824_v54 = vld [vmem:[%s5312_s1 + $0xd0] sm:$0xff] }
  0xfc   :  { %v317_v10 = vpop.f32.mrb[11].mxu1  ;;  %3812 = vmatprep.subr.bf16.mxu1 %v3811_v4 }
  0xfd   :  { %3167 = vmatprep.mubr.f32.mxu1 %v317_v10  ;;  %v1357_v10 = vld [vmem:[%s5312_s1 + $0x158] sm:$0xff] }
  0xfe   :  { %3168 = vmatmul.mubr.f32.gmra.mrb[18].mxu1 %v3125_v8  ;;  %v1356_v8 = vld [vmem:[%s5312_s1 + $0x150] sm:$0xff] }
  0xff   :  { %3814 = vmatpush3.bf16.msra.mxu1 %v3811_v4  ;;  %v3128_v15 = vpop.f32.mrb[12].mxu1  ;;  %v1095_v4 = vld [vmem:[%s5312_s1 + $0x138] sm:$0xff] }
 0x100   :  { %v327_v18 = vpop.f32.mrb[13].mxu1  ;;  %3816 = vmatprep.subr.bf16.mxu1 %v3815_v11 }
 0x101   :  { %3170 = vmatprep.mubr.f32.mxu1 %v327_v18  ;;  %v1622_v18 = vld [vmem:[%s5312_s1 + $0x190] sm:$0xff] }
 0x102   :  { %3171 = vmatmul.mubr.f32.gmra.mrb[20].mxu1 %v3128_v15  ;;  %v1361_v15 = vld [vmem:[%s5312_s1 + $0x178] sm:$0xff] }
 0x103   :  { %3818 = vmatpush3.bf16.msra.mxu1 %v3815_v11  ;;  %v3131_v23 = vpop.f32.mrb[14].mxu1  ;;  %v1358_v11 = vld [vmem:[%s5312_s1 + $0x160] sm:$0xff] }
 0x104   :  { %v337_v26 = vpop.f32.mrb[15].mxu1  ;;  %3820 = vmatprep.subr.bf16.mxu1 %v3819_v19 }
 0x105   :  { %3173 = vmatprep.mubr.f32.mxu1 %v337_v26  ;;  %v574_v26 = vld [vmem:[%s5313_s2 + $0x150] sm:$0xff] }
 0x106   :  { %3174 = vmatmul.mubr.f32.gmra.mrb[22].mxu1 %v3131_v23  ;;  %v3871_v23 = vpack.c.bf16 %v573_v22, %v572_v21 }
 0x107   :  { %3822 = vmatpush3.bf16.msra.mxu1 %v3819_v19  ;;  %3208 = vmatprep.mubr.f32.mxu1 %v154_v56  ;;  %v826_v56 = vld [vmem:[%s5312_s1 + $0xe0] sm:$0xff]  ;;  %v1623_v19 = vld [vmem:[%s5312_s1 + $0x198] sm:$0xff] }
 0x108   :  { %3824 = vmatprep.subr.bf16.mxu1 %v3823_v27  ;;  %3872 = vmatprep.subr.bf16.mxu0 %v3871_v23 }
 0x109   :  { %3874 = vmatpush3.bf16.msra.mxu0 %v3871_v23 }
 0x10b   :  { %3826 = vmatpush3.bf16.msra.mxu1 %v3823_v27  ;;  %v575_v27 = vld [vmem:[%s5313_s2 + $0x158] sm:$0xff] }
 0x10c   :  { %3828 = vmatprep.subr.bf16.mxu1 %v3827_v33  ;;  %v3875_v28 = vpack.c.bf16 %v575_v27, %v574_v26 }
 0x10e   :  { %3876 = vmatprep.subr.bf16.mxu0 %v3875_v28 }
 0x10f   :  { %3830 = vmatpush3.bf16.msra.mxu1 %v3827_v33  ;;  %3878 = vmatpush3.bf16.msra.mxu0 %v3875_v28  ;;  %v3879_v33 = vpack.c.bf16 %v577_v32, %v576_v31 }
 0x110   :  { %3832 = vmatprep.subr.bf16.mxu1 %v3831_v40 }
 0x111   :  { %3880 = vmatprep.subr.bf16.mxu0 %v3879_v33 }
 0x113   :  { %3834 = vmatpush3.bf16.msra.mxu1 %v3831_v40  ;;  %3882 = vmatpush3.bf16.msra.mxu0 %v3879_v33  ;;  %v1890_v40 = vld [vmem:[%s5312_s1 + $0x1e0] sm:$0xff] }
 0x114   :  { %3836 = vmatprep.subr.bf16.mxu1 %v3835_v43  ;;  %3884 = vmatprep.subr.bf16.mxu0 %v3883_v38 }
 0x117   :  { %3838 = vmatpush3.bf16.msra.mxu1 %v3835_v43  ;;  %3886 = vmatpush3.bf16.msra.mxu0 %v3883_v38  ;;  %v1891_v43 = vld [vmem:[%s5312_s1 + $0x1e8] sm:$0xff] }
 0x118   :  { %3840 = vmatprep.subr.bf16.mxu1 %v4319_v3 }
 0x11a   :  { %3209 = vmatmul.mubr.f32.vlgmr.msra.gmra.mrb[16].mxu1 %v4476_v55  ;;  %v825_v55 = vld [vmem:[%s5312_s1 + $0xd8] sm:$0xff] }
 0x11b   :  { %3211 = vmatprep.mubr.f32.mxu1 %v4480_v58  ;;  %3842 = vmatpush3.bf16.msra.mxu1 %v4319_v3  ;;  %v828_v58 = vld [vmem:[%s5312_s1 + $0xf0] sm:$0xff] }
 0x11c   :  { %3844 = vmatprep.subr.bf16.mxu1 %v4324_v5 }
 0x11e   :  { %3212 = vmatmul.mubr.f32.gmra.mrb[18].mxu1 %v4478_v57  ;;  %v827_v57 = vld [vmem:[%s5312_s1 + $0xe8] sm:$0xff] }
 0x11f   :  { %3214 = vmatprep.mubr.f32.mxu1 %v4484_v60  ;;  %3846 = vmatpush3.bf16.msra.mxu1 %v4324_v5  ;;  %v1088_v60 = vld [vmem:[%s5312_s1 + $0x100] sm:$0xff] }
 0x120   :  { %3848 = vmatprep.subr.bf16.mxu1 %v4339_v9 }
 0x122   :  { %3215 = vmatmul.mubr.f32.gmra.mrb[20].mxu1 %v4482_v59  ;;  %v829_v59 = vld [vmem:[%s5312_s1 + $0xf8] sm:$0xff] }
 0x123   :  { %3217 = vmatprep.mubr.f32.mxu1 %v4488_v62  ;;  %3850 = vmatpush3.bf16.msra.mxu1 %v4339_v9  ;;  %v1090_v62 = vld [vmem:[%s5312_s1 + $0x110] sm:$0xff] }
 0x124   :  { %3852 = vmatprep.subr.bf16.mxu1 %v4349_v12 }
 0x126   :  { %3218 = vmatmul.mubr.f32.gmra.mrb[22].mxu1 %v4486_v61  ;;  %v1089_v61 = vld [vmem:[%s5312_s1 + $0x108] sm:$0xff] }
 0x127   :  { %3854 = vmatpush3.bf16.msra.mxu1 %v4349_v12  ;;  %3236 = vmatprep.mubr.msk.f32.mxu1 %vm63_vm0, %v556_v44  ;;  %v1892_v44 = vld [vmem:[%s5312_s1 + $0x1f0] sm:$0xff] }
 0x128   :  { %3888 = vmatprep.subr.bf16.mxu1 %v4319_v3 }
 0x12a   :  { %3237 = vmatmul.mubr.msk.f32.vlgmr.msra.gmra.mrb[24].mxu1 %vm63_vm0, %v557_v45  ;;  %v2152_v45 = vld [vmem:[%s5312_s1 + $0x200] sm:$0xff] }
 0x12b   :  { %3890 = vmatpush3.bf16.msra.mxu1 %v4319_v3  ;;  %3239 = vmatprep.mubr.msk.f32.mxu1 %vm63_vm0, %v558_v46  ;;  %v2154_v46 = vld [vmem:[%s5312_s1 + $0x210] sm:$0xff] }
 0x12c   :  { %3892 = vmatprep.subr.bf16.mxu1 %v4324_v5 }
 0x12e   :  { %3240 = vmatmul.mubr.msk.f32.gmra.mrb[26].mxu1 %vm63_vm0, %v559_v47  ;;  %v2155_v47 = vld [vmem:[%s5312_s1 + $0x218] sm:$0xff] }
 0x12f   :  { %3894 = vmatpush3.bf16.msra.mxu1 %v4324_v5  ;;  %3242 = vmatprep.mubr.msk.f32.mxu1 %vm63_vm0, %v560_v48  ;;  %v2157_v48 = vld [vmem:[%s5312_s1 + $0x228] sm:$0xff] }
 0x130   :  { %3896 = vmatprep.subr.bf16.mxu1 %v4339_v9 }
 0x132   :  { %3243 = vmatmul.mubr.msk.f32.gmra.mrb[28].mxu1 %vm63_vm0, %v561_v49  ;;  %v2158_v49 = vld [vmem:[%s5312_s1 + $0x230] sm:$0xff] }
 0x133   :  { %3898 = vmatpush3.bf16.msra.mxu1 %v4339_v9  ;;  %3245 = vmatprep.mubr.msk.f32.mxu1 %vm63_vm0, %v562_v50  ;;  %v2159_v50 = vld [vmem:[%s5312_s1 + $0x238] sm:$0xff] }
 0x134   :  { %3900 = vmatprep.subr.bf16.mxu1 %v4349_v12 }
 0x136   :  { %3246 = vmatmul.mubr.msk.f32.gmra.mrb[30].mxu1 %vm63_vm0, %v563_v51 }
 0x137   :  { %3902 = vmatpush3.bf16.msra.mxu1 %v4349_v12  ;;  %3308 = vmatprep.mubr.msk.f32.mxu1 %vm63_vm0, %v822_v52 }
 0x138   :  { %3936 = vmatprep.subr.bf16.mxu1 %v4319_v3 }
 0x13a   :  { %3309 = vmatmul.mubr.msk.f32.vlgmr.msra.gmra.mrb[32].mxu1 %vm63_vm0, %v823_v53 }
 0x13b   :  { %3938 = vmatpush3.bf16.msra.mxu1 %v4319_v3  ;;  %3311 = vmatprep.mubr.msk.f32.mxu1 %vm63_vm0, %v824_v54 }
 0x13c   :  { %3940 = vmatprep.subr.bf16.mxu1 %v4324_v5 }
 0x13e   :  { %3312 = vmatmul.mubr.msk.f32.gmra.mrb[34].mxu1 %vm63_vm0, %v825_v55 }
 0x13f   :  { %3942 = vmatpush3.bf16.msra.mxu1 %v4324_v5  ;;  %3314 = vmatprep.mubr.msk.f32.mxu1 %vm63_vm0, %v826_v56 }
 0x140   :  { %3944 = vmatprep.subr.bf16.mxu1 %v4339_v9 }
 0x142   :  { %3315 = vmatmul.mubr.msk.f32.gmra.mrb[36].mxu1 %vm63_vm0, %v827_v57 }
 0x143   :  { %3946 = vmatpush3.bf16.msra.mxu1 %v4339_v9  ;;  %3317 = vmatprep.mubr.msk.f32.mxu1 %vm63_vm0, %v828_v58 }
 0x144   :  { %3948 = vmatprep.subr.bf16.mxu1 %v4349_v12 }
 0x146   :  { %3318 = vmatmul.mubr.msk.f32.gmra.mrb[38].mxu1 %vm63_vm0, %v829_v59  ;;  %v832_v59 = vld [vmem:[%s5313_s2 + $0x190] sm:$0xff] }
 0x147   :  { %3950 = vmatpush3.bf16.msra.mxu1 %v4349_v12  ;;  %3380 = vmatprep.mubr.msk.f32.mxu1 %vm63_vm0, %v1088_v60  ;;  %v833_v60 = vld [vmem:[%s5313_s2 + $0x198] sm:$0xff] }
 0x148   :  { %3984 = vmatprep.subr.bf16.mxu1 %v4319_v3 }
 0x14a   :  { %3381 = vmatmul.mubr.msk.f32.vlgmr.msra.gmra.mrb[40].mxu1 %vm63_vm0, %v1089_v61 }
 0x14b   :  { %3986 = vmatpush3.bf16.msra.mxu1 %v4319_v3  ;;  %3383 = vmatprep.mubr.msk.f32.mxu1 %vm63_vm0, %v1090_v62 }
 0x14c   :  { %3988 = vmatprep.subr.bf16.mxu1 %v4324_v5 }
 0x14e   :  { %3384 = vmatmul.mubr.msk.f32.gmra.mrb[42].mxu1 %vm63_vm0, %v1091_v63  ;;  %v3907_v63 = vpack.c.bf16 %v833_v60, %v832_v59  ;;  %v1105_v59 = vld [vmem:[%s5313_s2 + $0x248] sm:$0xff] }
 0x14f   :  { %3990 = vmatpush3.bf16.msra.mxu1 %v4324_v5  ;;  %3386 = vmatprep.mubr.msk.f32.mxu1 %vm63_vm0, %v1092_v0  ;;  %v834_v0 = vld [vmem:[%s5313_s2 + $0x1a0] sm:$0xff] }
 0x150   :  { %3992 = vmatprep.subr.bf16.mxu1 %v4339_v9 }
 0x152   :  { %3387 = vmatmul.mubr.msk.f32.gmra.mrb[44].mxu1 %vm63_vm0, %v1093_v1  ;;  %v835_v1 = vld [vmem:[%s5313_s2 + $0x1a8] sm:$0xff] }
 0x153   :  { %3994 = vmatpush3.bf16.msra.mxu1 %v4339_v9  ;;  %3389 = vmatprep.mubr.msk.f32.mxu1 %vm63_vm0, %v1094_v2 }
 0x154   :  { %3996 = vmatprep.subr.bf16.mxu1 %v4349_v12 }
 0x156   :  { %3390 = vmatmul.mubr.msk.f32.gmra.mrb[46].mxu1 %vm63_vm0, %v1095_v4  ;;  %v3911_v4 = vpack.c.bf16 %v835_v1, %v834_v0  ;;  %v1107_v0 = vld [vmem:[%s5313_s2 + $0x258] sm:$0xff] }
 0x157   :  { %3998 = vmatpush3.bf16.msra.mxu1 %v4349_v12  ;;  %3452 = vmatprep.mubr.msk.f32.mxu1 %vm63_vm0, %v1354_v6 }
 0x158   :  { %4032 = vmatprep.subr.bf16.mxu1 %v4319_v3 }
 0x15a   :  { %3453 = vmatmul.mubr.msk.f32.vlgmr.msra.gmra.mrb[48].mxu1 %vm63_vm0, %v1355_v7  ;;  %v836_v7 = vld [vmem:[%s5313_s2 + $0x1b0] sm:$0xff] }
 0x15b   :  { %4034 = vmatpush3.bf16.msra.mxu1 %v4319_v3  ;;  %3455 = vmatprep.mubr.msk.f32.mxu1 %vm63_vm0, %v1356_v8  ;;  %v837_v8 = vld [vmem:[%s5313_s2 + $0x1b8] sm:$0xff] }
 0x15c   :  { %4036 = vmatprep.subr.bf16.mxu1 %v4324_v5 }
 0x15e   :  { %3456 = vmatmul.mubr.msk.f32.gmra.mrb[50].mxu1 %vm63_vm0, %v1357_v10 }
 0x15f   :  { %4038 = vmatpush3.bf16.msra.mxu1 %v4324_v5  ;;  %3458 = vmatprep.mubr.msk.f32.mxu1 %vm63_vm0, %v1358_v11  ;;  %v3915_v11 = vpack.c.bf16 %v837_v8, %v836_v7  ;;  %v1109_v7 = vld [vmem:[%s5313_s2 + $0x268] sm:$0xff] }
 0x160   :  { %4040 = vmatprep.subr.bf16.mxu1 %v4339_v9 }
 0x162   :  { %3459 = vmatmul.mubr.msk.f32.gmra.mrb[52].mxu1 %vm63_vm0, %v1359_v13 }
 0x163   :  { %4042 = vmatpush3.bf16.msra.mxu1 %v4339_v9  ;;  %3461 = vmatprep.mubr.msk.f32.mxu1 %vm63_vm0, %v1360_v14  ;;  %v838_v14 = vld [vmem:[%s5313_s2 + $0x1c0] sm:$0xff] }
 0x164   :  { %4044 = vmatprep.subr.bf16.mxu1 %v4349_v12 }
 0x166   :  { %3462 = vmatmul.mubr.msk.f32.gmra.mrb[54].mxu1 %vm63_vm0, %v1361_v15  ;;  %v839_v15 = vld [vmem:[%s5313_s2 + $0x1c8] sm:$0xff] }
 0x167   :  { %4046 = vmatpush3.bf16.msra.mxu1 %v4349_v12  ;;  %3524 = vmatprep.mubr.msk.f32.mxu1 %vm63_vm0, %v1620_v16 }
 0x168   :  { %4080 = vmatprep.subr.bf16.mxu1 %v4319_v3 }
 0x16a   :  { %3525 = vmatmul.mubr.msk.f32.vlgmr.msra.gmra.mrb[56].mxu1 %vm63_vm0, %v1621_v17  ;;  %v3919_v17 = vpack.c.bf16 %v839_v15, %v838_v14  ;;  %v1111_v14 = vld [vmem:[%s5313_s2 + $0x278] sm:$0xff] }
 0x16b   :  { %4082 = vmatpush3.bf16.msra.mxu1 %v4319_v3  ;;  %3527 = vmatprep.mubr.msk.f32.mxu1 %vm63_vm0, %v1622_v18 }
 0x16c   :  { %4084 = vmatprep.subr.bf16.mxu1 %v4324_v5 }
 0x16e   :  { %3528 = vmatmul.mubr.msk.f32.gmra.mrb[58].mxu1 %vm63_vm0, %v1623_v19  ;;  %v840_v19 = vld [vmem:[%s5313_s2 + $0x1d0] sm:$0xff] }
 0x16f   :  { %4086 = vmatpush3.bf16.msra.mxu1 %v4324_v5  ;;  %3530 = vmatprep.mubr.msk.f32.mxu1 %vm63_vm0, %v1624_v20  ;;  %v841_v20 = vld [vmem:[%s5313_s2 + $0x1d8] sm:$0xff] }
 0x170   :  { %4088 = vmatprep.subr.bf16.mxu1 %v4339_v9  ;;  %v3923_v22 = vpack.c.bf16 %v841_v20, %v840_v19  ;;  %v1363_v19 = vld [vmem:[%s5313_s2 + $0x288] sm:$0xff] }
 0x172   :  { %3531 = vmatmul.mubr.msk.f32.gmra.mrb[60].mxu1 %vm63_vm0, %v1625_v24  ;;  %v842_v24 = vld [vmem:[%s5313_s2 + $0x1e0] sm:$0xff] }
 0x173   :  { %4090 = vmatpush3.bf16.msra.mxu1 %v4339_v9  ;;  %3533 = vmatprep.mubr.msk.f32.mxu1 %vm63_vm0, %v1626_v25  ;;  %v843_v25 = vld [vmem:[%s5313_s2 + $0x1e8] sm:$0xff] }
 0x174   :  { %4092 = vmatprep.subr.bf16.mxu1 %v4349_v12  ;;  %v3927_v27 = vpack.c.bf16 %v843_v25, %v842_v24  ;;  %v1365_v24 = vld [vmem:[%s5313_s2 + $0x298] sm:$0xff] }
 0x176   :  { %3534 = vmatmul.mubr.msk.f32.gmra.mrb[62].mxu1 %vm63_vm0, %v1627_v29  ;;  %v844_v29 = vld [vmem:[%s5313_s2 + $0x1f0] sm:$0xff] }
 0x177   :  { %4094 = vmatpush3.bf16.msra.mxu1 %v4349_v12  ;;  %3596 = vmatprep.mubr.msk.f32.mxu1 %vm63_vm0, %v1886_v30  ;;  %v845_v30 = vld [vmem:[%s5313_s2 + $0x1f8] sm:$0xff] }
 0x178   :  { %4128 = vmatprep.subr.bf16.mxu1 %v4319_v3  ;;  %v3931_v32 = vpack.c.bf16 %v845_v30, %v844_v29  ;;  %v1367_v29 = vld [vmem:[%s5313_s2 + $0x2a8] sm:$0xff] }
 0x17a   :  { %3597 = vmatmul.mubr.msk.f32.vlgmr.msra.gmra.mrb[64].mxu1 %vm63_vm0, %v1887_v34  ;;  %v1096_v34 = vld [vmem:[%s5313_s2 + $0x200] sm:$0xff] }
 0x17b   :  { %4130 = vmatpush3.bf16.msra.mxu1 %v4319_v3  ;;  %3599 = vmatprep.mubr.msk.f32.mxu1 %vm63_vm0, %v1888_v35  ;;  %v831_v3 = vld [vmem:[%s5313_s2 + $0x188] sm:$0xff] }
 0x17c   :  { %4132 = vmatprep.subr.bf16.mxu1 %v4324_v5  ;;  %v3903_v42 = vpack.c.bf16 %v831_v3, %v830_v41  ;;  %v1097_v35 = vld [vmem:[%s5313_s2 + $0x208] sm:$0xff] }
 0x17d   :  { %v3951_v37 = vpack.c.bf16 %v1097_v35, %v1096_v34  ;;  %v1369_v34 = vld [vmem:[%s5313_s2 + $0x2b8] sm:$0xff] }
 0x17e   :  { %3600 = vmatmul.mubr.msk.f32.gmra.mrb[66].mxu1 %vm63_vm0, %v1889_v39  ;;  %3904 = vmatprep.subr.bf16.mxu0 %v3903_v42  ;;  %v1098_v39 = vld [vmem:[%s5313_s2 + $0x210] sm:$0xff] }
 0x17f   :  { %4134 = vmatpush3.bf16.msra.mxu1 %v4324_v5  ;;  %3602 = vmatprep.mubr.msk.f32.mxu1 %vm63_vm0, %v1890_v40  ;;  %v1893_v5 = vld [vmem:[%s5312_s1 + $0x1f8] sm:$0xff] }
 0x180   :  { %4136 = vmatprep.subr.bf16.mxu1 %v4339_v9  ;;  %v1099_v40 = vld [vmem:[%s5313_s2 + $0x218] sm:$0xff] }
 0x181   :  { %v3955_v3 = vpack.c.bf16 %v1099_v40, %v1098_v39  ;;  %v1371_v39 = vld [vmem:[%s5313_s2 + $0x2c8] sm:$0xff] }
 0x182   :  { %3603 = vmatmul.mubr.msk.f32.gmra.mrb[68].mxu1 %vm63_vm0, %v1891_v43  ;;  %v1100_v43 = vld [vmem:[%s5313_s2 + $0x220] sm:$0xff] }
 0x183   :  { %4138 = vmatpush3.bf16.msra.mxu1 %v4339_v9  ;;  %3605 = vmatprep.mubr.msk.f32.mxu1 %vm63_vm0, %v1892_v44  ;;  %v2153_v9 = vld [vmem:[%s5312_s1 + $0x208] sm:$0xff] }
 0x184   :  { %4140 = vmatprep.subr.bf16.mxu1 %v4349_v12  ;;  %v1101_v44 = vld [vmem:[%s5313_s2 + $0x228] sm:$0xff] }
 0x186   :  { %3606 = vmatmul.mubr.msk.f32.gmra.mrb[70].mxu1 %vm63_vm0, %v1893_v5 }
 0x187   :  { %4142 = vmatpush3.bf16.msra.mxu1 %v4349_v12  ;;  %3668 = vmatprep.mubr.msk.f32.mxu1 %vm63_vm0, %v2152_v45  ;;  %v2156_v12 = vld [vmem:[%s5312_s1 + $0x220] sm:$0xff]  ;;  %v3959_v45 = vpack.c.bf16 %v1101_v44, %v1100_v43  ;;  %v1373_v43 = vld [vmem:[%s5313_s2 + $0x2d8] sm:$0xff] }
 0x18a   :  { %3669 = vmatmul.mubr.msk.f32.vlgmr.msra.gmra.mrb[72].mxu1 %vm63_vm0, %v2153_v9 }
 0x18b   :  { %3671 = vmatprep.mubr.msk.f32.mxu1 %vm63_vm0, %v2154_v46  ;;  %v1102_v46 = vld [vmem:[%s5313_s2 + $0x230] sm:$0xff] }
 0x18e   :  { %3672 = vmatmul.mubr.msk.f32.gmra.mrb[74].mxu1 %vm63_vm0, %v2155_v47  ;;  %v1103_v47 = vld [vmem:[%s5313_s2 + $0x238] sm:$0xff] }
 0x18f   :  { %3674 = vmatprep.mubr.msk.f32.mxu1 %vm63_vm0, %v2156_v12 }
 0x192   :  { %3675 = vmatmul.mubr.msk.f32.gmra.mrb[76].mxu1 %vm63_vm0, %v2157_v48  ;;  %v3963_v48 = vpack.c.bf16 %v1103_v47, %v1102_v46  ;;  %v1375_v46 = vld [vmem:[%s5313_s2 + $0x2e8] sm:$0xff] }
 0x193   :  { %3677 = vmatprep.mubr.msk.f32.mxu1 %vm63_vm0, %v2158_v49 }
 0x196   :  { %3678 = vmatmul.mubr.msk.f32.gmra.mrb[78].mxu1 %vm63_vm0, %v2159_v50  ;;  %v1104_v50 = vld [vmem:[%s5313_s2 + $0x240] sm:$0xff] }
 0x1ed   :  { %v4873_v51 = vpop.f32.mrb[16].mxu1 }
 0x1ee   :  { %v4875_v52 = vpop.f32.mrb[17].mxu1 }
 0x1f1   :  { %v4877_v53 = vpop.f32.mrb[18].mxu1 }
 0x1f2   :  { %v4879_v54 = vpop.f32.mrb[19].mxu1 }
 0x1f5   :  { %v4881_v55 = vpop.f32.mrb[20].mxu1 }
 0x1f6   :  { %v4883_v56 = vpop.f32.mrb[21].mxu1 }
 0x1f9   :  { %v4885_v57 = vpop.f32.mrb[22].mxu1 }
 0x1fa   :  { %v4887_v58 = vpop.f32.mrb[23].mxu1 }
 0x1fd   :  { %v3238_v61 = vpop.f32.mrb[24].mxu1 }
 0x1fe   :  { %v670_v62 = vpop.f32.mrb[25].mxu1 }
 0x1ff   :  { %3280 = vmatprep.mubr.f32.mxu0 %v670_v62 }
 0x200   :  { %3281 = vmatmul.mubr.f32.vlgmr.msra.gmra.mrb[0].mxu0 %v3238_v61  ;;  %v3967_v61 = vpack.c.bf16 %v1105_v59, %v1104_v50  ;;  %v1377_v50 = vld [vmem:[%s5313_s2 + $0x2f8] sm:$0xff] }
 0x201   :  { %3906 = vmatpush3.bf16.msra.mxu0 %v3903_v42  ;;  %v3241_v2 = vpop.f32.mrb[26].mxu1 }
 0x202   :  { %3908 = vmatprep.subr.bf16.mxu0 %v3907_v63  ;;  %v680_v6 = vpop.f32.mrb[27].mxu1 }
 0x203   :  { %3283 = vmatprep.mubr.f32.mxu0 %v680_v6  ;;  %v1108_v6 = vld [vmem:[%s5313_s2 + $0x260] sm:$0xff] }
 0x204   :  { %3284 = vmatmul.mubr.f32.gmra.mrb[2].mxu0 %v3241_v2 }
 0x205   :  { %3910 = vmatpush3.bf16.msra.mxu0 %v3907_v63  ;;  %v3244_v10 = vpop.f32.mrb[28].mxu1  ;;  %v1106_v63 = vld [vmem:[%s5313_s2 + $0x250] sm:$0xff] }
 0x206   :  { %3912 = vmatprep.subr.bf16.mxu0 %v3911_v4  ;;  %v690_v13 = vpop.f32.mrb[29].mxu1  ;;  %v3971_v2 = vpack.c.bf16 %v1107_v0, %v1106_v63  ;;  %v1629_v63 = vld [vmem:[%s5313_s2 + $0x308] sm:$0xff] }
 0x207   :  { %3286 = vmatprep.mubr.f32.mxu0 %v690_v13  ;;  %v1110_v13 = vld [vmem:[%s5313_s2 + $0x270] sm:$0xff] }
 0x208   :  { %3287 = vmatmul.mubr.f32.gmra.mrb[4].mxu0 %v3244_v10  ;;  %v3975_v10 = vpack.c.bf16 %v1109_v7, %v1108_v6  ;;  %v1630_v6 = vld [vmem:[%s5313_s2 + $0x310] sm:$0xff]  ;;  %v1631_v7 = vld [vmem:[%s5313_s2 + $0x318] sm:$0xff] }
 0x209   :  { %3914 = vmatpush3.bf16.msra.mxu0 %v3911_v4  ;;  %v3247_v16 = vpop.f32.mrb[30].mxu1 }
 0x20a   :  { %3916 = vmatprep.subr.bf16.mxu0 %v3915_v11  ;;  %v700_v18 = vpop.f32.mrb[31].mxu1 }
 0x20b   :  { %3289 = vmatprep.mubr.f32.mxu0 %v700_v18  ;;  %v1362_v18 = vld [vmem:[%s5313_s2 + $0x280] sm:$0xff] }
 0x20c   :  { %3290 = vmatmul.mubr.f32.gmra.mrb[6].mxu0 %v3247_v16  ;;  %v3979_v16 = vpack.c.bf16 %v1111_v14, %v1110_v13  ;;  %v4051_v13 = vpack.c.bf16 %v1631_v7, %v1630_v6  ;;  %v1905_v6 = vld [vmem:[%s5313_s2 + $0x3d8] sm:$0xff]  ;;  %v1907_v7 = vld [vmem:[%s5313_s2 + $0x3e8] sm:$0xff] }
 0x20d   :  { %3918 = vmatpush3.bf16.msra.mxu0 %v3915_v11  ;;  %v3310_v21 = vpop.f32.mrb[32].mxu1 }
 0x20e   :  { %3920 = vmatprep.subr.bf16.mxu0 %v3919_v17  ;;  %v936_v23 = vpop.f32.mrb[33].mxu1 }
 0x20f   :  { %3352 = vmatprep.mubr.f32.mxu0 %v936_v23  ;;  %v1364_v23 = vld [vmem:[%s5313_s2 + $0x290] sm:$0xff] }
 0x211   :  { %3922 = vmatpush3.bf16.msra.mxu0 %v3919_v17  ;;  %v3313_v26 = vpop.f32.mrb[34].mxu1 }
 0x212   :  { %3924 = vmatprep.subr.bf16.mxu0 %v3923_v22  ;;  %v946_v28 = vpop.f32.mrb[35].mxu1 }
 0x215   :  { %3926 = vmatpush3.bf16.msra.mxu0 %v3923_v22  ;;  %v3316_v31 = vpop.f32.mrb[36].mxu1 }
 0x216   :  { %3928 = vmatprep.subr.bf16.mxu0 %v3927_v27  ;;  %v956_v33 = vpop.f32.mrb[37].mxu1 }
 0x219   :  { %3930 = vmatpush3.bf16.msra.mxu0 %v3927_v27  ;;  %v3319_v36 = vpop.f32.mrb[38].mxu1 }
 0x21a   :  { %3932 = vmatprep.subr.bf16.mxu0 %v3931_v32  ;;  %v966_v38 = vpop.f32.mrb[39].mxu1 }
 0x21d   :  { %3934 = vmatpush3.bf16.msra.mxu0 %v3931_v32  ;;  %v4943_v41 = vpop.f32.mrb[40].mxu1 }
 0x21e   :  { %3952 = vmatprep.subr.bf16.mxu0 %v3951_v37  ;;  %v1202_v42 = vpop.f32.mrb[41].mxu1 }
 0x220   :  { %3353 = vmatmul.mubr.f32.vlgmr.msra.gmra.mrb[0].mxu0 %v3310_v21  ;;  %v3999_v21 = vpack.c.bf16 %v1363_v19, %v1362_v18  ;;  %v1633_v18 = vld [vmem:[%s5313_s2 + $0x328] sm:$0xff] }
 0x221   :  { %3954 = vmatpush3.bf16.msra.mxu0 %v3951_v37  ;;  %3355 = vmatprep.mubr.f32.mxu0 %v946_v28  ;;  %v4951_v5 = vpop.f32.mrb[42].mxu1  ;;  %v1366_v28 = vld [vmem:[%s5313_s2 + $0x2a0] sm:$0xff] }
 0x222   :  { %3956 = vmatprep.subr.bf16.mxu0 %v3955_v3  ;;  %v1212_v9 = vpop.f32.mrb[43].mxu1 }
 0x224   :  { %3356 = vmatmul.mubr.f32.gmra.mrb[2].mxu0 %v3313_v26  ;;  %v4003_v26 = vpack.c.bf16 %v1365_v24, %v1364_v23  ;;  %v1634_v24 = vld [vmem:[%s5313_s2 + $0x330] sm:$0xff] }
 0x225   :  { %3958 = vmatpush3.bf16.msra.mxu0 %v3955_v3  ;;  %3358 = vmatprep.mubr.f32.mxu0 %v956_v33  ;;  %v4959_v12 = vpop.f32.mrb[44].mxu1  ;;  %v1368_v33 = vld [vmem:[%s5313_s2 + $0x2b0] sm:$0xff] }
 0x226   :  { %3960 = vmatprep.subr.bf16.mxu0 %v3959_v45  ;;  %v1222_v49 = vpop.f32.mrb[45].mxu1 }
 0x228   :  { %3359 = vmatmul.mubr.f32.gmra.mrb[4].mxu0 %v3316_v31  ;;  %v4007_v31 = vpack.c.bf16 %v1367_v29, %v1366_v28  ;;  %v1636_v29 = vld [vmem:[%s5313_s2 + $0x340] sm:$0xff] }
 0x229   :  { %3962 = vmatpush3.bf16.msra.mxu0 %v3959_v45  ;;  %3361 = vmatprep.mubr.f32.mxu0 %v966_v38  ;;  %v4967_v60 = vpop.f32.mrb[46].mxu1  ;;  %v1370_v38 = vld [vmem:[%s5313_s2 + $0x2c0] sm:$0xff] }
 0x22a   :  { %3964 = vmatprep.subr.bf16.mxu0 %v3963_v48  ;;  %v1232_v62 = vpop.f32.mrb[47].mxu1 }
 0x22c   :  { %3362 = vmatmul.mubr.f32.gmra.mrb[6].mxu0 %v3319_v36  ;;  %v4011_v36 = vpack.c.bf16 %v1369_v34, %v1368_v33  ;;  %v1638_v34 = vld [vmem:[%s5313_s2 + $0x350] sm:$0xff] }
 0x22d   :  { %3966 = vmatpush3.bf16.msra.mxu0 %v3963_v48  ;;  %3424 = vmatprep.mubr.f32.mxu0 %v1202_v42  ;;  %v4975_v1 = vpop.f32.mrb[48].mxu1  ;;  %v1372_v42 = vld [vmem:[%s5313_s2 + $0x2d0] sm:$0xff] }
 0x22e   :  { %3968 = vmatprep.subr.bf16.mxu0 %v3967_v61  ;;  %v1468_v4 = vpop.f32.mrb[49].mxu1 }
 0x231   :  { %3970 = vmatpush3.bf16.msra.mxu0 %v3967_v61  ;;  %v4983_v8 = vpop.f32.mrb[50].mxu1 }
 0x232   :  { %3972 = vmatprep.subr.bf16.mxu0 %v3971_v2  ;;  %v4985_v11 = vpop.f32.mrb[51].mxu1 }
 0x235   :  { %3974 = vmatpush3.bf16.msra.mxu0 %v3971_v2  ;;  %v4993_v15 = vpop.f32.mrb[52].mxu1 }
 0x236   :  { %3976 = vmatprep.subr.bf16.mxu0 %v3975_v10  ;;  %v4995_v17 = vpop.f32.mrb[53].mxu1 }
 0x239   :  { %3978 = vmatpush3.bf16.msra.mxu0 %v3975_v10  ;;  %v5003_v20 = vpop.f32.mrb[54].mxu1 }
 0x23a   :  { %3980 = vmatprep.subr.bf16.mxu0 %v3979_v16  ;;  %v5005_v22 = vpop.f32.mrb[55].mxu1 }
 0x23d   :  { %3982 = vmatpush3.bf16.msra.mxu0 %v3979_v16  ;;  %v5013_v25 = vpop.f32.mrb[56].mxu1  ;;  %v1632_v16 = vld [vmem:[%s5313_s2 + $0x320] sm:$0xff] }
 0x23e   :  { %4000 = vmatprep.subr.bf16.mxu0 %v3999_v21  ;;  %v5015_v27 = vpop.f32.mrb[57].mxu1 }
 0x240   :  { %3425 = vmatmul.mubr.f32.vlgmr.msra.gmra.mrb[0].mxu0 %v4943_v41  ;;  %v4015_v41 = vpack.c.bf16 %v1371_v39, %v1370_v38  ;;  %v1641_v38 = vld [vmem:[%s5313_s2 + $0x368] sm:$0xff] }
 0x241   :  { %4002 = vmatpush3.bf16.msra.mxu0 %v3999_v21  ;;  %3427 = vmatprep.mubr.f32.mxu0 %v1212_v9  ;;  %v5024_v30 = vpop.f32.mrb[58].mxu1  ;;  %v1374_v9 = vld [vmem:[%s5313_s2 + $0x2e0] sm:$0xff]  ;;  %v4055_v21 = vpack.c.bf16 %v1633_v18, %v1632_v16 }
 0x242   :  { %4004 = vmatprep.subr.bf16.mxu0 %v4003_v26  ;;  %v5026_v32 = vpop.f32.mrb[59].mxu1  ;;  %v2160_v18 = vld [vmem:[%s5313_s2 + $0x400] sm:$0xff] }
 0x244   :  { %3428 = vmatmul.mubr.f32.gmra.mrb[2].mxu0 %v4951_v5  ;;  %v4019_v5 = vpack.c.bf16 %v1373_v43, %v1372_v42  ;;  %v1894_v42 = vld [vmem:[%s5313_s2 + $0x380] sm:$0xff]  ;;  %v1895_v43 = vld [vmem:[%s5313_s2 + $0x388] sm:$0xff] }
 0x245   :  { %4006 = vmatpush3.bf16.msra.mxu0 %v4003_v26  ;;  %3430 = vmatprep.mubr.f32.mxu0 %v1222_v49  ;;  %v5035_v35 = vpop.f32.mrb[60].mxu1  ;;  %v1376_v49 = vld [vmem:[%s5313_s2 + $0x2f0] sm:$0xff]  ;;  %v1635_v26 = vld [vmem:[%s5313_s2 + $0x338] sm:$0xff] }
 0x246   :  { %4008 = vmatprep.subr.bf16.mxu0 %v4007_v31  ;;  %v5037_v37 = vpop.f32.mrb[61].mxu1 }
 0x248   :  { %3431 = vmatmul.mubr.f32.gmra.mrb[4].mxu0 %v4959_v12  ;;  %v4023_v12 = vpack.c.bf16 %v1375_v46, %v1374_v9  ;;  %v1896_v9 = vld [vmem:[%s5313_s2 + $0x390] sm:$0xff]  ;;  %v1897_v46 = vld [vmem:[%s5313_s2 + $0x398] sm:$0xff] }
 0x249   :  { %4010 = vmatpush3.bf16.msra.mxu0 %v4007_v31  ;;  %3433 = vmatprep.mubr.f32.mxu0 %v1232_v62  ;;  %v5046_v40 = vpop.f32.mrb[62].mxu1  ;;  %v1628_v62 = vld [vmem:[%s5313_s2 + $0x300] sm:$0xff]  ;;  %v1637_v31 = vld [vmem:[%s5313_s2 + $0x348] sm:$0xff] }
 0x24a   :  { %4012 = vmatprep.subr.bf16.mxu0 %v4011_v36  ;;  %v5048_v3 = vpop.f32.mrb[63].mxu1  ;;  %v4047_v2 = vpack.c.bf16 %v1629_v63, %v1628_v62  ;;  %v1900_v62 = vld [vmem:[%s5313_s2 + $0x3b0] sm:$0xff]  ;;  %v1901_v63 = vld [vmem:[%s5313_s2 + $0x3b8] sm:$0xff] }
 0x24c   :  { %3434 = vmatmul.mubr.f32.gmra.mrb[6].mxu0 %v4967_v60  ;;  %v4027_v60 = vpack.c.bf16 %v1377_v50, %v1376_v49  ;;  %v1898_v49 = vld [vmem:[%s5313_s2 + $0x3a0] sm:$0xff]  ;;  %v1899_v50 = vld [vmem:[%s5313_s2 + $0x3a8] sm:$0xff] }
 0x24d   :  { %4014 = vmatpush3.bf16.msra.mxu0 %v4011_v36  ;;  %3496 = vmatprep.mubr.f32.mxu0 %v1468_v4  ;;  %v5057_v44 = vpop.f32.mrb[64].mxu1  ;;  %v1639_v36 = vld [vmem:[%s5313_s2 + $0x358] sm:$0xff] }
 0x24e   :  { %4016 = vmatprep.subr.bf16.mxu0 %v4015_v41  ;;  %v5059_v45 = vpop.f32.mrb[65].mxu1 }
 0x251   :  { %4018 = vmatpush3.bf16.msra.mxu0 %v4015_v41  ;;  %v5067_v47 = vpop.f32.mrb[66].mxu1 }
 0x252   :  { %4020 = vmatprep.subr.bf16.mxu0 %v4019_v5  ;;  %v5069_v48 = vpop.f32.mrb[67].mxu1 }
 0x255   :  { %4022 = vmatpush3.bf16.msra.mxu0 %v4019_v5  ;;  %v5077_v59 = vpop.f32.mrb[68].mxu1  ;;  %v4095_v5 = vpack.c.bf16 %v1895_v43, %v1894_v42  ;;  %v4264_v42 = vmov 0.0  }
 0x256   :  { %4024 = vmatprep.subr.bf16.mxu0 %v4023_v12  ;;  %v5079_v61 = vpop.f32.mrb[69].mxu1  ;;  %3740 = vmatprep.mubr.msk.f32.mxu1 %vm4263_vm1, %v4264_v42  ;;  %v2703_v42 = vld [vmem:[%s5314_s3] ss:$0 sm:$0xff] }
 0x259   :  { %4026 = vmatpush3.bf16.msra.mxu0 %v4023_v12  ;;  %v5087_v0 = vpop.f32.mrb[70].mxu1  ;;  %v4099_v12 = vpack.c.bf16 %v1897_v46, %v1896_v9 }
 0x25a   :  { %4028 = vmatprep.subr.bf16.mxu0 %v4027_v60  ;;  %v5089_v4 = vpop.f32.mrb[71].mxu1 }
 0x25d   :  { %4030 = vmatpush3.bf16.msra.mxu0 %v4027_v60  ;;  %v5097_v10 = vpop.f32.mrb[72].mxu1  ;;  %v4103_v60 = vpack.c.bf16 %v1899_v50, %v1898_v49 }
 0x25e   :  { %4048 = vmatprep.subr.bf16.mxu0 %v4047_v2  ;;  %v5099_v14 = vpop.f32.mrb[73].mxu1 }
 0x260   :  { %3497 = vmatmul.mubr.f32.vlgmr.msra.gmra.mrb[0].mxu0 %v4975_v1 }
 0x261   :  { %4050 = vmatpush3.bf16.msra.mxu0 %v4047_v2  ;;  %3499 = vmatprep.mubr.f32.mxu0 %v4985_v11  ;;  %v5109_v19 = vpop.f32.mrb[74].mxu1  ;;  %v4059_v11 = vpack.c.bf16 %v1635_v26, %v1634_v24  ;;  %v1903_v2 = vld [vmem:[%s5313_s2 + $0x3c8] sm:$0xff]  ;;  %v2162_v26 = vld [vmem:[%s5313_s2 + $0x410] sm:$0xff] }
 0x262   :  { %4052 = vmatprep.subr.bf16.mxu0 %v4051_v13  ;;  %v5111_v23 = vpop.f32.mrb[75].mxu1 }
 0x264   :  { %3500 = vmatmul.mubr.f32.gmra.mrb[2].mxu0 %v4983_v8 }
 0x265   :  { %4054 = vmatpush3.bf16.msra.mxu0 %v4051_v13  ;;  %3502 = vmatprep.mubr.f32.mxu0 %v4995_v17  ;;  %v5121_v1 = vpop.f32.mrb[76].mxu1  ;;  %v4063_v17 = vpack.c.bf16 %v1637_v31, %v1636_v29  ;;  %v2164_v31 = vld [vmem:[%s5313_s2 + $0x420] sm:$0xff] }
 0x266   :  { %4056 = vmatprep.subr.bf16.mxu0 %v4055_v21  ;;  %v5123_v28 = vpop.f32.mrb[77].mxu1 }
 0x268   :  { %3503 = vmatmul.mubr.f32.gmra.mrb[4].mxu0 %v4993_v15  ;;  %v4067_v15 = vpack.c.bf16 %v1639_v36, %v1638_v34  ;;  %v2166_v36 = vld [vmem:[%s5313_s2 + $0x430] sm:$0xff] }
 0x269   :  { %4058 = vmatpush3.bf16.msra.mxu0 %v4055_v21  ;;  %3505 = vmatprep.mubr.f32.mxu0 %v5005_v22  ;;  %v5133_v8 = vpop.f32.mrb[78].mxu1  ;;  %v1640_v22 = vld [vmem:[%s5313_s2 + $0x360] sm:$0xff]  ;;  %v2161_v21 = vld [vmem:[%s5313_s2 + $0x408] sm:$0xff] }
 0x26a   :  { %4060 = vmatprep.subr.bf16.mxu0 %v4059_v11  ;;  %v5135_v33 = vpop.f32.mrb[79].mxu1  ;;  %v4071_v39 = vpack.c.bf16 %v1641_v38, %v1640_v22  ;;  %v4143_v24 = vpack.c.bf16 %v2161_v21, %v2160_v18  ;;  %v2169_v22 = vld [vmem:[%s5313_s2 + $0x448] sm:$0xff]  ;;  %v2171_v38 = vld [vmem:[%s5313_s2 + $0x458] sm:$0xff] }
 0x26c   :  { %3506 = vmatmul.mubr.f32.gmra.mrb[6].mxu0 %v5003_v20  ;;  %v1642_v20 = vld [vmem:[%s5313_s2 + $0x370] sm:$0xff] }
 0x26d   :  { %4062 = vmatpush3.bf16.msra.mxu0 %v4059_v11  ;;  %3568 = vmatprep.mubr.f32.mxu0 %v5015_v27  ;;  %v1643_v27 = vld [vmem:[%s5313_s2 + $0x378] sm:$0xff] }
 0x26e   :  { %4064 = vmatprep.subr.bf16.mxu0 %v4063_v17  ;;  %v4075_v41 = vpack.c.bf16 %v1643_v27, %v1642_v20  ;;  %v2163_v11 = vld [vmem:[%s5313_s2 + $0x418] sm:$0xff] }
 0x26f   :  { %v4147_v29 = vpack.c.bf16 %v2163_v11, %v2162_v26 }
 0x271   :  { %4066 = vmatpush3.bf16.msra.mxu0 %v4063_v17  ;;  %v2165_v17 = vld [vmem:[%s5313_s2 + $0x428] sm:$0xff] }
 0x272   :  { %4068 = vmatprep.subr.bf16.mxu0 %v4067_v15  ;;  %v4151_v34 = vpack.c.bf16 %v2165_v17, %v2164_v31 }
 0x275   :  { %4070 = vmatpush3.bf16.msra.mxu0 %v4067_v15  ;;  %v2167_v15 = vld [vmem:[%s5313_s2 + $0x438] sm:$0xff] }
 0x276   :  { %4072 = vmatprep.subr.bf16.mxu0 %v4071_v39 }
 0x279   :  { %4074 = vmatpush3.bf16.msra.mxu0 %v4071_v39  ;;  %v2173_v39 = vld [vmem:[%s5313_s2 + $0x468] sm:$0xff] }
 0x27a   :  { %4076 = vmatprep.subr.bf16.mxu0 %v4075_v41 }
 0x27d   :  { %4078 = vmatpush3.bf16.msra.mxu0 %v4075_v41  ;;  %v4262_v41 = vmov 0.0|0.0  }
 0x27e   :  { %4096 = vmatprep.subr.bf16.mxu0 %v4095_v5  ;;  %4175 = vmatprep.subr.bf16.mxu1 %v4262_v41 }
 0x280   :  { %3569 = vmatmul.mubr.f32.vlgmr.msra.gmra.mrb[0].mxu0 %v5013_v25  ;;  %v4107_v25 = vpack.c.bf16 %v1901_v63, %v1900_v62 }
 0x281   :  { %4098 = vmatpush3.bf16.msra.mxu0 %v4095_v5  ;;  %3571 = vmatprep.mubr.f32.mxu0 %v5026_v32  ;;  %v1902_v32 = vld [vmem:[%s5313_s2 + $0x3c0] sm:$0xff] }
 0x282   :  { %4100 = vmatprep.subr.bf16.mxu0 %v4099_v12 }
 0x284   :  { %3572 = vmatmul.mubr.f32.gmra.mrb[2].mxu0 %v5024_v30  ;;  %v4111_v30 = vpack.c.bf16 %v1903_v2, %v1902_v32 }
 0x285   :  { %4102 = vmatpush3.bf16.msra.mxu0 %v4099_v12  ;;  %3574 = vmatprep.mubr.f32.mxu0 %v5037_v37  ;;  %v1904_v37 = vld [vmem:[%s5313_s2 + $0x3d0] sm:$0xff] }
 0x286   :  { %4104 = vmatprep.subr.bf16.mxu0 %v4103_v60 }
 0x288   :  { %3575 = vmatmul.mubr.f32.gmra.mrb[4].mxu0 %v5035_v35  ;;  %v4115_v35 = vpack.c.bf16 %v1905_v6, %v1904_v37 }
 0x289   :  { %4106 = vmatpush3.bf16.msra.mxu0 %v4103_v60  ;;  %3577 = vmatprep.mubr.f32.mxu0 %v5048_v3  ;;  %v1906_v3 = vld [vmem:[%s5313_s2 + $0x3e0] sm:$0xff] }
 0x28a   :  { %4108 = vmatprep.subr.bf16.mxu0 %v4107_v25  ;;  %v4119_v13 = vpack.c.bf16 %v1907_v7, %v1906_v3 }
 0x28c   :  { %3578 = vmatmul.mubr.f32.gmra.mrb[6].mxu0 %v5046_v40  ;;  %v1908_v40 = vld [vmem:[%s5313_s2 + $0x3f0] sm:$0xff] }
 0x28d   :  { %4110 = vmatpush3.bf16.msra.mxu0 %v4107_v25  ;;  %3640 = vmatprep.mubr.f32.mxu0 %v5059_v45  ;;  %v1909_v45 = vld [vmem:[%s5313_s2 + $0x3f8] sm:$0xff] }
 0x28e   :  { %4112 = vmatprep.subr.bf16.mxu0 %v4111_v30  ;;  %v4123_v16 = vpack.c.bf16 %v1909_v45, %v1908_v40 }
 0x291   :  { %4114 = vmatpush3.bf16.msra.mxu0 %v4111_v30 }
 0x292   :  { %4116 = vmatprep.subr.bf16.mxu0 %v4115_v35 }
 0x295   :  { %4118 = vmatpush3.bf16.msra.mxu0 %v4115_v35 }
 0x296   :  { %4120 = vmatprep.subr.bf16.mxu0 %v4119_v13 }
 0x299   :  { %4122 = vmatpush3.bf16.msra.mxu0 %v4119_v13 }
 0x29a   :  { %4124 = vmatprep.subr.bf16.mxu0 %v4123_v16 }
 0x29d   :  { %4126 = vmatpush3.bf16.msra.mxu0 %v4123_v16 }
 0x29e   :  { %4144 = vmatprep.subr.bf16.mxu0 %v4143_v24 }
 0x2a0   :  { %3641 = vmatmul.mubr.f32.vlgmr.msra.gmra.mrb[0].mxu0 %v5057_v44  ;;  %v4155_v44 = vpack.c.bf16 %v2167_v15, %v2166_v36 }
 0x2a1   :  { %4146 = vmatpush3.bf16.msra.mxu0 %v4143_v24  ;;  %3643 = vmatprep.mubr.f32.mxu0 %v5069_v48  ;;  %v2168_v48 = vld [vmem:[%s5313_s2 + $0x440] sm:$0xff] }
 0x2a2   :  { %4148 = vmatprep.subr.bf16.mxu0 %v4147_v29 }
 0x2a4   :  { %3644 = vmatmul.mubr.f32.gmra.mrb[2].mxu0 %v5067_v47  ;;  %v4159_v47 = vpack.c.bf16 %v2169_v22, %v2168_v48 }
 0x2a5   :  { %4150 = vmatpush3.bf16.msra.mxu0 %v4147_v29  ;;  %3646 = vmatprep.mubr.f32.mxu0 %v5079_v61  ;;  %v2170_v61 = vld [vmem:[%s5313_s2 + $0x450] sm:$0xff] }
 0x2a6   :  { %4152 = vmatprep.subr.bf16.mxu0 %v4151_v34 }
 0x2a8   :  { %3647 = vmatmul.mubr.f32.gmra.mrb[4].mxu0 %v5077_v59  ;;  %v4163_v59 = vpack.c.bf16 %v2171_v38, %v2170_v61 }
 0x2a9   :  { %4154 = vmatpush3.bf16.msra.mxu0 %v4151_v34  ;;  %3649 = vmatprep.mubr.f32.mxu0 %v5089_v4  ;;  %v2172_v4 = vld [vmem:[%s5313_s2 + $0x460] sm:$0xff] }
 0x2aa   :  { %4156 = vmatprep.subr.bf16.mxu0 %v4155_v44  ;;  %v4167_v20 = vpack.c.bf16 %v2173_v39, %v2172_v4 }
 0x2ac   :  { %3650 = vmatmul.mubr.f32.gmra.mrb[6].mxu0 %v5087_v0  ;;  %v2174_v0 = vld [vmem:[%s5313_s2 + $0x470] sm:$0xff] }
 0x2ad   :  { %4158 = vmatpush3.bf16.msra.mxu0 %v4155_v44  ;;  %3712 = vmatprep.mubr.f32.mxu0 %v5099_v14  ;;  %v2175_v14 = vld [vmem:[%s5313_s2 + $0x478] sm:$0xff] }
 0x2ae   :  { %4160 = vmatprep.subr.bf16.mxu0 %v4159_v47  ;;  %v4171_v27 = vpack.c.bf16 %v2175_v14, %v2174_v0 }
 0x2b1   :  { %4162 = vmatpush3.bf16.msra.mxu0 %v4159_v47 }
 0x2b2   :  { %4164 = vmatprep.subr.bf16.mxu0 %v4163_v59 }
 0x2b5   :  { %4166 = vmatpush3.bf16.msra.mxu0 %v4163_v59 }
 0x2b6   :  { %4168 = vmatprep.subr.bf16.mxu0 %v4167_v20 }
 0x2b9   :  { %4170 = vmatpush3.bf16.msra.mxu0 %v4167_v20 }
 0x2ba   :  { %4172 = vmatprep.subr.bf16.mxu0 %v4171_v27 }
 0x2bd   :  { %4174 = vmatpush3.bf16.msra.mxu0 %v4171_v27 }
 0x2c0   :  { %3713 = vmatmul.mubr.f32.vlgmr.msra.gmra.mrb[0].mxu0 %v5097_v10 }
 0x2c1   :  { %3715 = vmatprep.mubr.f32.mxu0 %v5111_v23 }
 0x2c4   :  { %3716 = vmatmul.mubr.f32.gmra.mrb[2].mxu0 %v5109_v19 }
 0x2c5   :  { %3718 = vmatprep.mubr.f32.mxu0 %v5123_v28 }
 0x2c8   :  { %3719 = vmatmul.mubr.f32.gmra.mrb[4].mxu0 %v5121_v1 }
 0x2c9   :  { %3721 = vmatprep.mubr.f32.mxu0 %v5135_v33 }
 0x2cc   :  { %3722 = vmatmul.mubr.f32.gmra.mrb[6].mxu0 %v5133_v8 }
 0x393   :  { %v3714_v43 = vpop.f32.mrb[0].mxu0 }
 0x394   :  { %v4187_v10 = vadd.f32 %v3714_v43, %v4873_v51  ;;  %v2371_v23 = vpop.f32.mrb[1].mxu0 }
 0x395   :  { %v4188_v19 = vadd.f32 %v2371_v23, %v4875_v52 }
 0x397   :  { %v2418_v5 = vadd.f32 %v4188_v19, %v4187_v10  ;;  %v3717_v28 = vpop.f32.mrb[2].mxu0 }
 0x398   :  { %v4189_v1 = vadd.f32 %v3717_v28, %v4877_v53  ;;  %v2381_v9 = vpop.f32.mrb[3].mxu0  ;;  %v2704_v28 = vld [vmem:[%s5315_s4] ss:$0 sm:$0xff] }
 0x399   :  { %v4190_v33 = vadd.f32 %v2381_v9, %v4879_v54 }
 0x39b   :  { %v2419_v8 = vadd.f32 %v4190_v33, %v2418_v5  ;;  %v3720_v46 = vpop.f32.mrb[4].mxu0 }
 0x39c   :  { %v4191_v12 = vadd.f32 %v3720_v46, %v4881_v55  ;;  %v2391_v49 = vpop.f32.mrb[5].mxu0 }
 0x39d   :  { %v4192_v50 = vadd.f32 %v2391_v49, %v4883_v56  ;;  %v2420_v60 = vadd.f32 %v4189_v1, %v2419_v8 }
 0x39f   :  { %v2421_v62 = vadd.f32 %v4192_v50, %v2420_v60  ;;  %v3723_v51 = vpop.f32.mrb[6].mxu0 }
 0x3a0   :  { %v4193_v63 = vadd.f32 %v3723_v51, %v4885_v57  ;;  %v2401_v52 = vpop.f32.mrb[7].mxu0 }
 0x3a1   :  { %v4194_v25 = vadd.f32 %v2401_v52, %v4887_v58  ;;  %v2422_v32 = vadd.f32 %v4191_v12, %v2421_v62 }
 0x3a3   :  { %v2423_v53 = vadd.f32 %v4194_v25, %v2422_v32 }
 0x3a5   :  { %v2424_v2 = vadd.f32 %v4193_v63, %v2423_v53 }
 0x3a7   :  { %v2425_v30 = vrot.slane %v2424_v2, 4 }
 0x3a9   :  { %v2426_v54 = vadd.f32 %v2425_v30, %v2424_v2  ;;  %v2527_v30 = vld [vmem:[%s5316_s5] sm:$0xff] }
 0x3ab   :  { %v2427_v37 = vrot.slane %v2426_v54, 2 }
 0x3ad   :  { %v2428_v6 = vadd.f32 %v2427_v37, %v2426_v54  ;;  %v2528_v54 = vld [vmem:[%s5316_s5 + $0x8] sm:$0xff] }
 0x3af   :  { %v2429_v35 = vrot.slane %v2428_v6, 1 }
 0x3b1   :  { %v2430_v55 = vadd.f32 %v2429_v35, %v2428_v6 }
 0x3b3   :  { %v2432_v3 = vmul.f32 0.015625, %v2430_v55 }
 0x3b5   :  { %v2433_v7 = vsub.f32 %v4188_v19, %v2432_v3  ;;  %v2434_v56 = vsub.f32 %v4187_v10, %v2432_v3  ;;  %v2435_v13 = vsub.f32 %v4190_v33, %v2432_v3  ;;  %v2436_v40 = vsub.f32 %v4189_v1, %v2432_v3 }
 0x3b6   :  { %v2437_v45 = vsub.f32 %v4192_v50, %v2432_v3  ;;  %v2438_v16 = vsub.f32 %v4191_v12, %v2432_v3  ;;  %v2439_v57 = vsub.f32 %v4194_v25, %v2432_v3  ;;  %v2440_v18 = vsub.f32 %v4193_v63, %v2432_v3 }
 0x3b7   :  { %v2441_v21 = vmul.f32 %v2433_v7, %v2433_v7  ;;  %v2442_v58 = vmul.f32 %v2434_v56, %v2434_v56  ;;  %v2443_v24 = vmul.f32 %v2435_v13, %v2435_v13  ;;  %v2444_v11 = vmul.f32 %v2436_v40, %v2436_v40 }
 0x3b8   :  { %v2445_v31 = vmul.f32 %v2437_v45, %v2437_v45  ;;  %v2446_v34 = vmul.f32 %v2438_v16, %v2438_v16  ;;  %v2447_v15 = vmul.f32 %v2439_v57, %v2439_v57  ;;  %v2448_v48 = vmul.f32 %v2440_v18, %v2440_v18 }
 0x3b9   :  { %v2449_v26 = vadd.f32 %v2442_v58, %v2441_v21 }
 0x3bb   :  { %v2450_v29 = vadd.f32 %v2449_v26, %v2443_v24 }
 0x3bd   :  { %v2451_v17 = vadd.f32 %v2450_v29, %v2444_v11 }
 0x3bf   :  { %v2452_v36 = vadd.f32 %v2451_v17, %v2445_v31 }
 0x3c1   :  { %v2453_v44 = vadd.f32 %v2452_v36, %v2446_v34 }
 0x3c3   :  { %v2454_v22 = vadd.f32 %v2453_v44, %v2447_v15 }
 0x3c5   :  { %v2455_v47 = vadd.f32 %v2454_v22, %v2448_v48 }
 0x3c7   :  { %v2456_v61 = vrot.slane %v2455_v47, 4 }
 0x3c9   :  { %v2457_v38 = vadd.f32 %v2456_v61, %v2455_v47 }
 0x3cb   :  { %v2458_v59 = vrot.slane %v2457_v38, 2 }
 0x3cd   :  { %v2459_v4 = vadd.f32 %v2458_v59, %v2457_v38  ;;  %v2529_v59 = vld [vmem:[%s5317_s6] sm:$0xf] }
 0x3cf   :  { %v2460_v39 = vrot.slane %v2459_v4, 1 }
 0x3d1   :  { %v2461_v20 = vadd.f32 %v2460_v39, %v2459_v4  ;;  %v13_v4 = vstv %s5318_s7 }
 0x3d2   :  { %14 = vst [vmem:[#allocation2] sm:$0x1] %v13_v4 }
 0x3d3   :  { %v2462_v0 = vmul.f32 0.015625, %v2461_v20 }
 0x3d5   :  { %v2463_v14 = vadd.f32 1e-05, %v2462_v0 }
 0x3d7   :  { %4256 = vrsqrt.f32 %v2463_v14 }
 0x3d9   :  { %v2615_v39 = vld [vmem:[#allocation2] sm:$0x1] }
 0x3da   :  { %4251 = vpush %v2615_v39 }
 0x3e1   :  { %v4257_v27 = vpop.eup %4256 }
 0x3e2   :  { %v2468_v43 = vmul.f32 %v4257_v27, %v2436_v40  ;;  %v2469_v10 = vmul.f32 %v4257_v27, %v2437_v45  ;;  %v2470_v23 = vmul.f32 %v4257_v27, %v2438_v16  ;;  %v2471_v19 = vmul.f32 %v4257_v27, %v2439_v57 }
 0x3e3   :  { %v2472_v5 = vmul.f32 %v4257_v27, %v2440_v18  ;;  %v2465_v1 = vmul.f32 %v4257_v27, %v2433_v7  ;;  %v2466_v9 = vmul.f32 %v4257_v27, %v2434_v56  ;;  %v2467_v33 = vmul.f32 %v4257_v27, %v2435_v13 }
 0x3e4   :  { %v2485_v8 = vmul.f32 %v2703_v42, %v2470_v23  ;;  %v2486_v46 = vmul.f32 %v2703_v42, %v2471_v19  ;;  %v2483_v12 = vmul.f32 %v2703_v42, %v2468_v43  ;;  %v2484_v49 = vmul.f32 %v2703_v42, %v2469_v10 }
 0x3e5   :  { %v2487_v50 = vmul.f32 %v2703_v42, %v2472_v5  ;;  %v2480_v60 = vmul.f32 %v2703_v42, %v2465_v1  ;;  %v2481_v62 = vmul.f32 %v2703_v42, %v2466_v9  ;;  %v2482_v51 = vmul.f32 %v2703_v42, %v2467_v33 }
 0x3e6   :  { %v2501_v63 = vadd.f32 %v2704_v28, %v2486_v46  ;;  %v2498_v52 = vadd.f32 %v2704_v28, %v2483_v12  ;;  %v2499_v25 = vadd.f32 %v2704_v28, %v2484_v49  ;;  %v2500_v32 = vadd.f32 %v2704_v28, %v2485_v8 }
 0x3e7   :  { %v2495_v53 = vadd.f32 %v2704_v28, %v2480_v60  ;;  %v2496_v2 = vadd.f32 %v2704_v28, %v2481_v62  ;;  %v2497_v37 = vadd.f32 %v2704_v28, %v2482_v51  ;;  %v2502_v6 = vadd.f32 %v2704_v28, %v2487_v50 }
 0x3e8   :  { %v2517_v35 = vmul.f32 0.2, %v2501_v63  ;;  %vm2506_vm2 = vcmp.ge.f32.partialorder %v2498_v52, 0.0  ;;  %v2514_v55 = vmul.f32 0.2, %v2498_v52  ;;  %vm2507_vm3 = vcmp.ge.f32.partialorder %v2499_v25, 0.0 }
 0x3e9   :  { %vm2503_vm4 = vcmp.ge.f32.partialorder %v2495_v53, 0.0  ;;  %vm2504_vm5 = vcmp.ge.f32.partialorder %v2496_v2, 0.0  ;;  %v2511_v3 = vmul.f32 0.2, %v2495_v53  ;;  %v2512_v7 = vmul.f32 0.2, %v2496_v2 }
 0x3ea   :  { %vm2505_vm6 = vcmp.ge.f32.partialorder %v2497_v37, 0.0  ;;  %v2513_v56 = vmul.f32 0.2, %v2497_v37  ;;  %v2522_v13 = vsel %vm2506_vm2, %v2498_v52, %v2514_v55  ;;  %vm2508_vm7 = vcmp.ge.f32.partialorder %v2500_v32, 0.0 }
 0x3eb   :  { %v2519_v40 = vsel %vm2503_vm4, %v2495_v53, %v2511_v3  ;;  %v2520_v45 = vsel %vm2504_vm5, %v2496_v2, %v2512_v7  ;;  %v2533_v16 = vmul.f32 %v2528_v54, %v2522_v13  ;;  %v2515_v57 = vmul.f32 0.2, %v2499_v25 }
 0x3ec   :  { %v2530_v18 = vmul.f32 %v2527_v30, %v2519_v40  ;;  %v2531_v21 = vmul.f32 %v2528_v54, %v2520_v45  ;;  %v2521_v58 = vsel %vm2505_vm6, %v2497_v37, %v2513_v56  ;;  %v2516_v24 = vmul.f32 0.2, %v2500_v32 }
 0x3ed   :  { %v2532_v26 = vmul.f32 %v2527_v30, %v2521_v58  ;;  %v2523_v11 = vsel %vm2507_vm3, %v2499_v25, %v2515_v57  ;;  %vm2509_vm8 = vcmp.ge.f32.partialorder %v2501_v63, 0.0  ;;  %vm2510_vm9 = vcmp.ge.f32.partialorder %v2502_v6, 0.0 }
 0x3ee   :  { %v4176_v29 = vpack.c.bf16 %v2531_v21, %v2530_v18  ;;  %v2524_v31 = vsel %vm2508_vm7, %v2500_v32, %v2516_v24  ;;  %v2534_v17 = vmul.f32 %v2527_v30, %v2523_v11  ;;  %v2518_v34 = vmul.f32 0.2, %v2502_v6 }
 0x3ef   :  { %v4179_v36 = vpack.c.bf16 %v2533_v16, %v2532_v26  ;;  %v2535_v15 = vmul.f32 %v2528_v54, %v2524_v31  ;;  %v2525_v44 = vsel %vm2509_vm8, %v2501_v63, %v2517_v35 }
 0x3f0   :  { %4177 = vmatpush3.bf16.msra.mxu1 %v4176_v29  ;;  %v2526_v48 = vsel %vm2510_vm9, %v2502_v6, %v2518_v34  ;;  %v2536_v22 = vmul.f32 %v2527_v30, %v2525_v44 }
 0x3f1   :  { %4178 = vmatprep.subr.bf16.mxu1 %v4262_v41  ;;  %v4182_v47 = vpack.c.bf16 %v2535_v15, %v2534_v17  ;;  %v2537_v61 = vmul.f32 %v2528_v54, %v2526_v48 }
 0x3f3   :  { %v4185_v38 = vpack.c.bf16 %v2537_v61, %v2536_v22 }
 0x3f4   :  { %4180 = vmatpush3.bf16.msra.mxu1 %v4179_v36 }
 0x3f5   :  { %4181 = vmatprep.subr.bf16.mxu1 %v4262_v41 }
 0x3f8   :  { %4183 = vmatpush3.bf16.msra.mxu1 %v4182_v47 }
 0x3f9   :  { %4184 = vmatprep.subr.bf16.mxu1 %v4262_v41 }
 0x3fc   :  { %4186 = vmatpush3.bf16.msra.mxu1 %v4185_v38 }
 0x3ff   :  { %3741 = vmatmul.mubr.msk.f32.vlgmr.msra.gmra.mrb[80].mxu1 %vm63_vm0, %v2529_v59 }
 0x40b   :  { %s4252_s15 = spop %4251 }
 0x40c   :  { %v2617_v41 = vstv %s4252_s15 }
 0x4d2   :  { %v2607_v20 = vpop.f32.mrb[80].mxu1 }
 0x4d3   :  { %v3742_v0 = vpop.f32.mrb[81].mxu1  ;;  %v2612_v14 = vsel %vm2611_vm10, %v2607_v20, 0.0 }
 0x4d4   :  { %2613 = vadd.xlane.f32.xlu0 %v2612_v14 }
 0x561   :  { %v2614_v27 = vpop.xlane.xlu0 %2613 }
 0x562   :  { %v2618_v42 = vadd.f32 %v2617_v41, %v2614_v27 }
 0x564   :  { %v2706_v43 = vmul.f32 -1.442695, %v2618_v42 }
 0x566   :  { %4258 = vpow2.f32 %v2706_v43 }
 0x570   :  { %v4259_v10 = vpop.eup %4258 }
 0x571   :  { %v2622_v23 = vadd.f32 1.0, %v4259_v10 }
 0x573   :  { %4260 = vrcp.f32 %v2622_v23 }
 0x57d   :  { %v4261_v19 = vpop.eup %4260 }
 0x57e   :  { %2626 = vst.msk [vmem:[%s5319_s8] sm:$0xf] %vm2625_vm11, %v4261_v19 }

</bundles_post_ra>
